<compile_context>
chip_gen: v7x
topology: tpu7x:2x2x1
jax: 0.10.0
libtpu: 0.0.40
codegen_flags: <defaults>
</compile_context>

<pallas_src>
import functools
import math

import jax
import jax.numpy as jnp
from jax.experimental import pallas as pl
from jax.experimental.pallas import tpu as pltpu


def _round_up(x, m):
    return ((x + m - 1) // m) * m


def _exp_normal_smearing_kernel(dist_ref, means_ref, betas_ref, out_ref,
                                *, alpha, cutoff_lower, cutoff_upper):
    # dist_ref:  (1, TILE_E)        f32   (edges lane-dense)
    # means_ref: (NUM_RBF, 1)       f32   (resident across the grid)
    # betas_ref: (NUM_RBF, 1)       f32   (resident across the grid)
    # out_ref:   (NUM_RBF, TILE_E)  f32   (lane-dense output tile)
    d = dist_ref[...]                       # (1, TILE_E)
    means = means_ref[...]                  # (NUM_RBF, 1)
    betas = betas_ref[...]                  # (NUM_RBF, 1)

    # Per-edge quantities, computed once on the small (1, TILE_E) vector.
    # CosineCutoff(0, cutoff_upper) — matches the PyTorch module, which never
    # uses cutoff_lower in the cutoff term.
    cutoffs = 0.5 * (jnp.cos(d * (math.pi / cutoff_upper)) + 1.0)
    cutoffs = jnp.where(d < cutoff_upper, cutoffs, 0.0)          # (1, TILE_E)
    e = jnp.exp(alpha * (cutoff_lower - d))                      # (1, TILE_E)

    # Single full-tile transcendental: exp over (NUM_RBF, TILE_E).
    diff = e - means                                             # (NUM_RBF, TILE_E)
    out_ref[...] = cutoffs * jnp.exp(-(betas * diff) * diff)


def exp_normal_smearing(dist, means, betas, *, cutoff_lower=0.0,
                        cutoff_upper=5.0, max_tile_e=4096):
    """dist: (E,) f32; means/betas: (num_rbf,) f32 -> (E, num_rbf) f32."""
    E = dist.shape[0]
    num_rbf = means.shape[0]
    alpha = 5.0 / (cutoff_upper - cutoff_lower)

    # Lane-aligned tile along E; ragged E is padded with distances at the
    # cutoff (those rows evaluate to 0 via the mask and are sliced off anyway).
    num_tiles = pl.cdiv(E, max_tile_e)
    tile_e = _round_up(pl.cdiv(E, num_tiles), 128)
    e_pad = num_tiles * tile_e

    dist_f32 = dist.astype(jnp.float32)
    if e_pad == E:
        dist_p = dist_f32.reshape(1, E)
    else:
        dist_p = jnp.full((1, e_pad), cutoff_upper, dtype=jnp.float32)
        dist_p = dist_p.at[0, :E].set(dist_f32)
    means2d = means.reshape(num_rbf, 1).astype(jnp.float32)
    betas2d = betas.reshape(num_rbf, 1).astype(jnp.float32)

    kernel = functools.partial(
        _exp_normal_smearing_kernel,
        alpha=alpha, cutoff_lower=cutoff_lower, cutoff_upper=cutoff_upper)

    cost = pl.CostEstimate(
        flops=6 * E * num_rbf,
        transcendentals=E * num_rbf + 2 * E,
        bytes_accessed=4 * (E + 2 * num_rbf + E * num_rbf))

    out_t = pl.pallas_call(
        kernel,
        out_shape=jax.ShapeDtypeStruct((num_rbf, e_pad), jnp.float32),
        grid_spec=pltpu.PrefetchScalarGridSpec(
            num_scalar_prefetch=0,
            grid=(num_tiles,),
            in_specs=[
                pl.BlockSpec((1, tile_e), lambda i: (0, i)),
                pl.BlockSpec((num_rbf, 1), lambda i: (0, 0)),   # resident block
                pl.BlockSpec((num_rbf, 1), lambda i: (0, 0)),   # resident block
            ],
            out_specs=pl.BlockSpec((num_rbf, tile_e), lambda i: (0, i)),
        ),
        compiler_params=pltpu.CompilerParams(
            dimension_semantics=("parallel",)),
        cost_estimate=cost,
    )(dist_p, means2d, betas2d)

    # Layout plumbing back to the PyTorch (E, num_rbf) orientation.
    if e_pad == E:
        return out_t.T
    return out_t[:, :E].T


def make_params(cutoff_lower=0.0, cutoff_upper=5.0, num_rbf=50):
    """Deterministic init matching ExpNormalSmearing._initial_params."""
    start_value = math.exp(-cutoff_upper + cutoff_lower)
    means = jnp.linspace(start_value, 1.0, num_rbf, dtype=jnp.float32)
    betas = jnp.full((num_rbf,),
                     (2.0 / num_rbf * (1.0 - start_value)) ** (-2),
                     dtype=jnp.float32)
    return means, betas


def _reference(dist, means, betas, cutoff_lower=0.0, cutoff_upper=5.0):
    alpha = 5.0 / (cutoff_upper - cutoff_lower)
    d = dist[:, None]
    cutoffs = 0.5 * (jnp.cos(d * math.pi / cutoff_upper) + 1.0)
    cutoffs = cutoffs * (d < cutoff_upper).astype(jnp.float32)
    return cutoffs * jnp.exp(
        -betas[None, :] * (jnp.exp(alpha * (-d + cutoff_lower)) - means[None, :]) ** 2)


if __name__ == "__main__":
    key = jax.random.PRNGKey(0)
    E = 2500              # ragged edge count: exercises padding + grid pipelining
    NUM_RBF = 50
    CUTOFF_UPPER = 5.0

    # distances in [0, 6) so that some exceed the cutoff (tests the mask)
    dist = jax.random.uniform(key, (E,), dtype=jnp.float32, minval=0.0, maxval=6.0)
    means, betas = make_params(0.0, CUTOFF_UPPER, NUM_RBF)

    out = exp_normal_smearing(dist, means, betas,
                              cutoff_lower=0.0, cutoff_upper=CUTOFF_UPPER)
    out = jax.block_until_ready(out)

    ref = _reference(dist, means, betas, 0.0, CUTOFF_UPPER)
    assert out.shape == (E, NUM_RBF)
    assert jnp.allclose(out, ref, atol=1e-5, rtol=1e-5), "mismatch vs reference"

    print("KERNEL_OK")
</pallas_src>

<mosaic_0001>
module attributes {stable_mosaic.version = 11 : i64} {
  func.func @_exp_normal_smearing_kernel(%arg0: i32, %arg1: memref<1x2560xf32, #tpu.memory_space<vmem>>, %arg2: memref<50x1xf32, #tpu.memory_space<vmem>>, %arg3: memref<50x1xf32, #tpu.memory_space<vmem>>, %arg4: memref<50x2560xf32, #tpu.memory_space<vmem>>) attributes {dimension_semantics = [#tpu.dimension_semantics<parallel>], iteration_bounds = array<i64: 1>, scalar_prefetch = 0 : i64, scratch_operands = 0 : i64, tpu.core_type = #tpu.core_type<tc>, window_params = [{transform_indices = @transform_0, window_bounds = array<i64: 1, 2560>}, {pipeline_mode = #tpu.pipeline_mode<synchronous>, transform_indices = @transform_1, window_bounds = array<i64: 50, 1>}, {pipeline_mode = #tpu.pipeline_mode<synchronous>, transform_indices = @transform_2, window_bounds = array<i64: 50, 1>}, {transform_indices = @transform_3, window_bounds = array<i64: 50, 2560>}]} {
    %c0 = arith.constant 0 : index
    %c0_0 = arith.constant 0 : index
    %0 = vector.load %arg1[%c0, %c0_0] : memref<1x2560xf32, #tpu.memory_space<vmem>>, vector<1x2560xf32>
    %c0_1 = arith.constant 0 : index
    %c0_2 = arith.constant 0 : index
    %1 = vector.load %arg2[%c0_1, %c0_2] : memref<50x1xf32, #tpu.memory_space<vmem>>, vector<50x1xf32>
    %c0_3 = arith.constant 0 : index
    %c0_4 = arith.constant 0 : index
    %2 = vector.load %arg3[%c0_3, %c0_4] : memref<50x1xf32, #tpu.memory_space<vmem>>, vector<50x1xf32>
    %cst = arith.constant 0.628318548 : f32
    %3 = vector.broadcast %cst : f32 to vector<1x2560xf32>
    %4 = arith.mulf %0, %3 : vector<1x2560xf32>
    %5 = math.cos %4 : vector<1x2560xf32>
    %cst_5 = arith.constant 1.000000e+00 : f32
    %6 = vector.broadcast %cst_5 : f32 to vector<1x2560xf32>
    %7 = arith.addf %5, %6 : vector<1x2560xf32>
    %cst_6 = arith.constant 5.000000e-01 : f32
    %8 = vector.broadcast %cst_6 : f32 to vector<1x2560xf32>
    %9 = arith.mulf %8, %7 : vector<1x2560xf32>
    %cst_7 = arith.constant 5.000000e+00 : f32
    %10 = vector.broadcast %cst_7 : f32 to vector<1x2560xf32>
    %11 = arith.cmpf olt, %0, %10 : vector<1x2560xf32>
    %cst_8 = arith.constant 0.000000e+00 : f32
    %12 = vector.broadcast %cst_8 : f32 to vector<1x2560xf32>
    %13 = arith.select %11, %9, %12 : vector<1x2560xi1>, vector<1x2560xf32>
    %cst_9 = arith.constant 0.000000e+00 : f32
    %14 = vector.broadcast %cst_9 : f32 to vector<1x2560xf32>
    %15 = arith.subf %14, %0 : vector<1x2560xf32>
    %cst_10 = arith.constant 1.000000e+00 : f32
    %16 = vector.broadcast %cst_10 : f32 to vector<1x2560xf32>
    %17 = arith.mulf %16, %15 : vector<1x2560xf32>
    %18 = math.exp %17 : vector<1x2560xf32>
    %19 = vector.broadcast %18 : vector<1x2560xf32> to vector<50x2560xf32>
    %20 = vector.broadcast %1 : vector<50x1xf32> to vector<50x2560xf32>
    %21 = arith.subf %19, %20 : vector<50x2560xf32>
    %22 = vector.broadcast %2 : vector<50x1xf32> to vector<50x2560xf32>
    %23 = arith.mulf %22, %21 : vector<50x2560xf32>
    %cst_11 = arith.constant 0.000000e+00 : f32
    %24 = vector.broadcast %cst_11 : f32 to vector<50x2560xf32>
    %25 = arith.subf %24, %23 : vector<50x2560xf32>
    %26 = arith.mulf %25, %21 : vector<50x2560xf32>
    %27 = math.exp %26 : vector<50x2560xf32>
    %28 = vector.broadcast %13 : vector<1x2560xf32> to vector<50x2560xf32>
    %29 = arith.mulf %28, %27 : vector<50x2560xf32>
    %c0_12 = arith.constant 0 : index
    %c0_13 = arith.constant 0 : index
    %30 = vector.load %arg4[%c0_12, %c0_13] : memref<50x2560xf32, #tpu.memory_space<vmem>>, vector<50x2560xf32>
    tpu.vector_store %arg4[%c0_12, %c0_13], %29 {strides = array<i32>} : memref<50x2560xf32, #tpu.memory_space<vmem>>, vector<50x2560xf32>,
    return
  }
  func.func @transform_0(%arg0: i32) -> (i32, i32) {
    %c0_i32 = arith.constant 0 : i32
    %c0_i32_0 = arith.constant 0 : i32
    return %c0_i32, %arg0 : i32, i32
  }
  func.func @transform_1(%arg0: i32) -> (i32, i32) {
    %c0_i32 = arith.constant 0 : i32
    %c0_i32_0 = arith.constant 0 : i32
    %c0_i32_1 = arith.constant 0 : i32
    return %c0_i32, %c0_i32_0 : i32, i32
  }
  func.func @transform_2(%arg0: i32) -> (i32, i32) {
    %c0_i32 = arith.constant 0 : i32
    %c0_i32_0 = arith.constant 0 : i32
    %c0_i32_1 = arith.constant 0 : i32
    return %c0_i32, %c0_i32_0 : i32, i32
  }
  func.func @transform_3(%arg0: i32) -> (i32, i32) {
    %c0_i32 = arith.constant 0 : i32
    %c0_i32_0 = arith.constant 0 : i32
    return %c0_i32, %arg0 : i32, i32
  }
}

</mosaic_0001>

<bundles_post_ra>
// kernel: tpu_custom_call.1
= control target key start
LH: loop header
LB: loop body
LE: loop exit
PB: predicated region body
PF: predicated region fallthrough
CT: control target
= control target key end

     0   :  { %v2135_v2 = vmov 0   ;;  %s3838_s0 = inlined_call_operand.vmem [shape: f32[1,2560], index: 0, kind: input, shape index: {}]   ;;  %s3839_s1 = inlined_call_operand.vmem [shape: f32[50,1], index: 1, kind: input, shape index: {}]   ;;  %s3840_s2 = inlined_call_operand.vmem [shape: f32[50,1], index: 2, kind: input, shape index: {}]   ;;  %s3841_s3 = inlined_call_operand.hbm [shape: f32[50,2560], index: 3, kind: output, shape index: {}]  }
   0x1   :  { %v20_v0 = vld [vmem:[%s3839_s1 + $0x10] sm:$0xff]  ;;  %v18_v1 = vld [vmem:[%s3839_s1] sm:$0xff]  ;;  %1812 = vset.pattern.permute.xlu1 %v2135_v2  ;;  %1811 = vset.pattern.permute.xlu0 %v2135_v2  ;;  %v21_v3 = vld [vmem:[%s3839_s1 + $0x18] sm:$0xff] }
   0x2   :  { %480 = vperm.xlu1 %1812, %v20_v0   ;;  %470 = vperm.xlu0 %1811, %v18_v1   ;;  %v19_v4 = vld [vmem:[%s3839_s1 + $0x8] sm:$0xff]  ;;  %v2180_v5 = vld [vmem:[%s3838_s0] sm:$0xff] }
   0x3   :  { %v2185_v6 = vld [vmem:[%s3838_s0 + $0x8] sm:$0xff]  ;;  %v22_v8 = vld [vmem:[%s3839_s1 + $0x20] sm:$0xff]  ;;  %v2194_v9 = vmul.f32 0.62831855, %v2180_v5 }
   0x4   :  { %v23_v7 = vld [vmem:[%s3839_s1 + $0x28] sm:$0xff]  ;;  %v2197_v10 = vmul.f32 0.62831855, %v2185_v6 }
   0x6   :  { %485 = vperm.xlu1 %1812, %v21_v3   ;;  %475 = vperm.xlu0 %1811, %v19_v4  }
   0xa   :  { %495 = vperm.xlu1 %1812, %v23_v7   ;;  %490 = vperm.xlu0 %1811, %v22_v8  }
   0xb   :  { %8 = vsyncpa [#allocation3], 0  ;;  %v25_v11 = vld [vmem:[%s3840_s2] sm:$0xff]  ;;  %v24_v12 = vld [vmem:[%s3839_s1 + $0x30] sm:$0x3]  ;;  %v38_v14 = vand.u32 2139095040, %v2194_v9 }
   0xc   :  { %v2208_v13 = vld [vmem:[%s3838_s0 + $0x10] sm:$0xf]  ;;  %v141_v15 = vand.u32 2139095040, %v2197_v10  ;;  %v26_v18 = vld [vmem:[%s3840_s2 + $0x8] sm:$0xff]  ;;  %v35_v20 = vand.u32 2147483647, %v2194_v9 }
   0xd   :  { %v39_v16 = vshrl.u32 %v38_v14, 23  ;;  %v27_v17 = vld [vmem:[%s3840_s2 + $0x10] sm:$0xff]  ;;  %v2219_v19 = vmul.f32 0.62831855, %v2208_v13  ;;  %v138_v22 = vand.u32 2147483647, %v2197_v10 }
   0xe   :  { %645 = vperm.xlu1 %1812, %v25_v11   ;;  %500 = vperm.xlu0 %1811, %v24_v12   ;;  %v142_v23 = vshrl.u32 %v141_v15, 23  ;;  %v29_v25 = vld [vmem:[%s3840_s2 + $0x20] sm:$0xff]  ;;  %v28_v27 = vld [vmem:[%s3840_s2 + $0x18] sm:$0xff]  ;;  %v42_v28 = vand.u32 8388607, %v35_v20  ;;  %v30_v33 = vld [vmem:[%s3840_s2 + $0x28] sm:$0xff] }
   0xf   :  { %v1777_v21 = vadd.s32 4294967169, %v39_v16  ;;  %v244_v26 = vand.u32 2139095040, %v2219_v19  ;;  %v145_v30 = vand.u32 8388607, %v138_v22  ;;  %v31_v31 = vld [vmem:[%s3840_s2 + $0x30] sm:$0x3] }
  0x10   :  { %v1781_v29 = vadd.s32 4294967169, %v142_v23  ;;  %v43_v34 = vor.u32 8388608, %v42_v28  ;;  %v2136_v44 = vmov 683565275   ;;  %v2137_v46 = vmov 2475754826  }
  0x11   :  { %v45_v24 = vadd.s32 1, %v1777_v21  ;;  %v245_v32 = vshrl.u32 %v244_v26, 23  ;;  %v146_v36 = vor.u32 8388608, %v145_v30  ;;  %v2138_v48 = vmov 2131351028   ;;  %s2142_s2 = smov [#allocation2]  }
  0x12   :  { %655 = vperm.xlu1 %1812, %v27_v17   ;;  %650 = vperm.xlu0 %1811, %v26_v18   ;;  %v148_v37 = vadd.s32 1, %v1781_v29  ;;  %v2240_v40 = vshll.u32 %v43_v34, 8  ;;  %v2139_v50 = vmov 2102212464   ;;  %v2140_v52 = vmov 920167782  }
  0x13   :  { %vm46_vm0 = vcmp.gt.s32.totalorder %v45_v24, 0  ;;  %v2242_v41 = vshll.u32 %v146_v36, 8  ;;  %v2244_v42 = vadd.s32 4294967169, %v245_v32  ;;  %v2141_v59 = vmov 1326507024   ;;  %s1766_s17 = sshll.u32 %s2142_s2, 4  ;;  %s1767_s17 = int_to_ptr.vmem [resolvable:$true] %s1766_s17 }
  0x14   :  { %v47_v35 = vsel %vm46_vm0, %v45_v24, 0  ;;  %vm149_vm1 = vcmp.gt.s32.totalorder %v148_v37, 0  ;;  %s2111_s18 = scalar_lea.vmem %s1767_s17, 17920  ;;  %p2116_p1 = scmp.lt.s32.totalorder %s1767_s17, %s1767_s17 }
  0x15   :  { %v48_v38 = vshrl.u32 %v47_v35, 5  ;;  %v49_v39 = vand.u32 31, %v47_v35  ;;  %v150_v61 = vsel %vm149_vm1, %v148_v37, 0  ;;  %p2112_p0 = scmp.ne.s32.totalorder %s1767_s17, %s2111_s18  ;;  %p2117_p2 = scmp.lt.s32.totalorder %s2111_s18, %s2111_s18 }
  0x16   :  { %665 = vperm.xlu1 %1812, %v29_v25   ;;  %660 = vperm.xlu0 %1811, %v28_v27   ;;  %v151_v3 = vshrl.u32 %v150_v61, 5  ;;  %v152_v4 = vand.u32 31, %v150_v61 }
  0x17   :  { %v50_v43 = vsub.s32 32, %v49_v39  ;;  %v52_v45 = vshll.u32 %v2136_v44, %v49_v39  ;;  %v55_v47 = vshll.u32 %v2137_v46, %v49_v39  ;;  %v58_v49 = vshll.u32 %v2138_v48, %v49_v39  ;;  %p2118_p3 = por %p2117_p2, %p2116_p1 }
  0x18   :  { %v61_v51 = vshll.u32 %v2139_v50, %v49_v39  ;;  %v64_v53 = vshll.u32 %v2140_v52, %v49_v39  ;;  %vm67_vm2 = vcmp.lt.s32.totalorder %v48_v38, 1  ;;  %vm68_vm3 = vcmp.lt.s32.totalorder %v48_v38, 2 }
  0x19   :  { %v51_v54 = vshrl.u32 %v2136_v44, %v50_v43  ;;  %v53_v55 = vshrl.u32 %v2137_v46, %v50_v43  ;;  %v56_v56 = vshrl.u32 %v2138_v48, %v50_v43  ;;  %v59_v57 = vshrl.u32 %v2139_v50, %v50_v43  ;;  %p2119_p4 = pnand %p2118_p3, %p2112_p0 }
  0x1a   :  { %675 = vperm.xlu1 %1812, %v31_v31   ;;  %670 = vperm.xlu0 %1811, %v30_v33   ;;  %v62_v58 = vshrl.u32 %v2140_v52, %v50_v43  ;;  %v65_v60 = vshrl.u32 %v2141_v59, %v50_v43  ;;  %vm69_vm4 = vcmp.lt.s32.totalorder %v48_v38, 3  ;;  %vm70_vm5 = vcmp.lt.s32.totalorder %v48_v38, 4 }
  0x1b   :  { %v54_v62 = vor.u32 %v53_v55, %v52_v45  ;;  %v57_v63 = vor.u32 %v56_v56, %v55_v47  ;;  %v60_v0 = vor.u32 %v59_v57, %v58_v49  ;;  %v153_v17 = vsub.s32 32, %v152_v4 }
  0x1c   :  { %v63_v1 = vor.u32 %v62_v58, %v61_v51  ;;  %v66_v2 = vor.u32 %v65_v60, %v64_v53  ;;  %v155_v24 = vshll.u32 %v2136_v44, %v152_v4  ;;  %v158_v34 = vshll.u32 %v2137_v46, %v152_v4 }
  0x1d   :  { %v71_v7 = vsel %vm67_vm2, %v51_v54, %v54_v62  ;;  %v72_v8 = vsel %vm70_vm5, %v60_v0, 2102212464  ;;  %v75_v11 = vsel %vm67_vm2, %v54_v62, %v57_v63  ;;  %v79_v12 = vsel %vm67_vm2, %v57_v63, %v60_v0 }
  0x1e   :  { %v73_v14 = vsel %vm69_vm4, %v57_v63, %v72_v8  ;;  %v76_v15 = vsel %vm70_vm5, %v63_v1, 920167782  ;;  %v80_v16 = vsel %vm70_vm5, %v66_v2, 1326507024  ;;  %v154_v28 = vshrl.u32 %v2136_v44, %v153_v17 }
  0x1f   :  { %v74_v18 = vsel %vm68_vm3, %v71_v7, %v73_v14  ;;  %v77_v21 = vsel %vm69_vm4, %v60_v0, %v76_v15  ;;  %v81_v23 = vsel %vm69_vm4, %v63_v1, %v80_v16  ;;  %v156_v33 = vshrl.u32 %v2137_v46, %v153_v17 }
  0x20   :  { %v78_v25 = vsel %vm68_vm3, %v75_v11, %v77_v21  ;;  %v82_v26 = vsel %vm68_vm3, %v79_v12, %v81_v23  ;;  %v90_v27 = vmul.u32 %v2240_v40, %v74_v18  ;;  %v159_v35 = vshrl.u32 %v2138_v48, %v153_v17 }
  0x21   :  { %v2271_v29 = vmul.u32.u64.low %v2240_v40, %v82_v26  ;;  %v2272_v30 = vmul.u32.u64.high %v2240_v40, %v82_v26, %v2271_v29  ;;  %v2275_v31 = vmul.u32.u64.low %v2240_v40, %v78_v25  ;;  %v2276_v32 = vmul.u32.u64.high %v2240_v40, %v78_v25, %v2275_v31 }
  0x22   :  { %v161_v36 = vshll.u32 %v2138_v48, %v152_v4  ;;  %v162_v37 = vshrl.u32 %v2139_v50, %v153_v17  ;;  %v164_v38 = vshll.u32 %v2139_v50, %v152_v4  ;;  %v165_v39 = vshrl.u32 %v2140_v52, %v153_v17 }
  0x23   :  { %v167_v43 = vshll.u32 %v2140_v52, %v152_v4  ;;  %v157_v45 = vor.u32 %v156_v33, %v155_v24  ;;  %v160_v40 = vor.u32 %v159_v35, %v158_v34  ;;  %v168_v47 = vshrl.u32 %v2141_v59, %v153_v17 }
  0x24   :  { %vm170_vm6 = vcmp.lt.s32.totalorder %v151_v3, 1  ;;  %vm92_vm7 = vc.u32 %v2272_v30, %v2275_v31  ;;  %v93_v49 = vadd.s32 1, %v2276_v32  ;;  %v163_v51 = vor.u32 %v162_v37, %v161_v36 }
  0x25   :  { %v251_v53 = vadd.s32 1, %v2244_v42  ;;  %v166_v54 = vor.u32 %v165_v39, %v164_v38  ;;  %v169_v55 = vor.u32 %v168_v47, %v167_v43  ;;  %vm171_vm8 = vcmp.lt.s32.totalorder %v151_v3, 2 }
  0x26   :  { %vm172_vm9 = vcmp.lt.s32.totalorder %v151_v3, 3  ;;  %v94_v56 = vsel %vm92_vm7, %v93_v49, %v2276_v32  ;;  %vm173_vm10 = vcmp.lt.s32.totalorder %v151_v3, 4  ;;  %v174_v57 = vsel %vm170_vm6, %v154_v28, %v157_v45 }
  0x27   :  { %v178_v58 = vsel %vm170_vm6, %v157_v45, %v160_v40  ;;  %v95_v60 = vadd.s32 %v94_v56, %v90_v27  ;;  %v175_v61 = vsel %vm173_vm10, %v163_v51, 2102212464  ;;  %v179_v62 = vsel %vm173_vm10, %v166_v54, 920167782 }
  0x28   :  { %v182_v63 = vsel %vm170_vm6, %v160_v40, %v163_v51  ;;  %v176_v0 = vsel %vm172_vm9, %v160_v40, %v175_v61  ;;  %v180_v1 = vsel %vm172_vm9, %v163_v51, %v179_v62  ;;  %v183_v2 = vsel %vm173_vm10, %v169_v55, 1326507024 }
  0x29   :  { %v241_v42 = vand.u32 2147483647, %v2219_v19  ;;  %v96_v4 = vadd.s32 536870912, %v95_v60  ;;  %v181_v7 = vsel %vm171_vm8, %v178_v58, %v180_v1  ;;  %v184_v8 = vsel %vm172_vm9, %v166_v54, %v183_v2 }
  0x2a   :  { %vm252_vm11 = vcmp.gt.s32.totalorder %v251_v53, 0  ;;  %v177_v11 = vsel %vm171_vm8, %v174_v57, %v176_v0  ;;  %v185_v12 = vsel %vm171_vm8, %v182_v63, %v184_v8  ;;  %vm37_vm4 = vcmp.lt.s32.totalorder %v2194_v9, 0 }
  0x2b   :  { %v2301_v14 = vmul.u32.u64.low %v2242_v41, %v181_v7  ;;  %v2302_v15 = vmul.u32.u64.high %v2242_v41, %v181_v7, %v2301_v14  ;;  %v2305_v16 = vshrl.u32 %v96_v4, 30  ;;  %v253_v21 = vsel %vm252_vm11, %v251_v53, 0 }
  0x2c   :  { %v2308_v17 = vmul.u32.u64.low %v2242_v41, %v185_v12  ;;  %v2309_v18 = vmul.u32.u64.high %v2242_v41, %v185_v12, %v2308_v17  ;;  %v193_v24 = vmul.u32 %v2242_v41, %v177_v11  ;;  %v255_v25 = vand.u32 31, %v253_v21 }
  0x2d   :  { %v98_v23 = vshll.u32 %v2305_v16, 30  ;;  %v196_v3 = vadd.s32 1, %v2302_v15  ;;  %v248_v26 = vand.u32 8388607, %v241_v42  ;;  %v254_v36 = vshrl.u32 %v253_v21, 5 }
  0x2e   :  { %vm195_vm12 = vc.u32 %v2309_v18, %v2301_v14  ;;  %v256_v29 = vsub.s32 32, %v255_v25  ;;  %v258_v41 = vshll.u32 %v2136_v44, %v255_v25  ;;  %v261_v37 = vshll.u32 %v2137_v46, %v255_v25 }
  0x2f   :  { %v99_v27 = vsub.s32 %v95_v60, %v98_v23  ;;  %v197_v28 = vsel %vm195_vm12, %v196_v3, %v2302_v15  ;;  %v249_v34 = vor.u32 8388608, %v248_v26  ;;  %v264_v45 = vshll.u32 %v2138_v48, %v255_v25 }
  0x30   :  { %v198_v33 = vadd.s32 %v197_v28, %v193_v24  ;;  %v259_v39 = vshrl.u32 %v2137_v46, %v256_v29  ;;  %v262_v43 = vshrl.u32 %v2138_v48, %v256_v29  ;;  %v265_v47 = vshrl.u32 %v2139_v50, %v256_v29 }
  0x31   :  { %v101_v32 = vsub.s32 0, %v99_v27  ;;  %v267_v49 = vshll.u32 %v2139_v50, %v255_v25  ;;  %v268_v51 = vshrl.u32 %v2140_v52, %v256_v29  ;;  %v270_v54 = vshll.u32 %v2140_v52, %v255_v25 }
  0x32   :  { %v199_v38 = vadd.s32 536870912, %v198_v33  ;;  %v271_v55 = vshrl.u32 %v2141_v59, %v256_v29  ;;  %v91_v46 = vadd.s32 %v2275_v31, %v2272_v30  ;;  %v257_v57 = vshrl.u32 %v2136_v44, %v256_v29 }
  0x33   :  { %v1778_v35 = vmin.u32 %v101_v32, %v99_v27  ;;  %v289_v48 = vshll.u32 %v249_v34, 8  ;;  %v260_v60 = vor.u32 %v259_v39, %v258_v41  ;;  %v263_v61 = vor.u32 %v262_v43, %v261_v37 }
  0x34   :  { %v2327_v53 = vshrl.u32 %v199_v38, 30  ;;  %v269_v50 = vor.u32 %v268_v51, %v267_v49  ;;  %v266_v62 = vor.u32 %v265_v47, %v264_v45  ;;  %vm273_vm14 = vcmp.lt.s32.totalorder %v254_v36, 1 }
  0x35   :  { %v103_v40 = vclz %v1778_v35  ;;  %vm276_vm15 = vcmp.lt.s32.totalorder %v254_v36, 4  ;;  %v272_v0 = vor.u32 %v271_v55, %v270_v54  ;;  %vm275_vm0 = vcmp.lt.s32.totalorder %v254_v36, 3 }
  0x36   :  { %v201_v58 = vshll.u32 %v2327_v53, 30  ;;  %v278_v31 = vsel %vm276_vm15, %v266_v62, 2102212464  ;;  %vm274_vm1 = vcmp.lt.s32.totalorder %v254_v36, 2  ;;  %v281_v2 = vsel %vm273_vm14, %v260_v60, %v263_v61 }
  0x37   :  { %v1779_v56 = vadd.s32 4294967294, %v103_v40  ;;  %v282_v4 = vsel %vm276_vm15, %v269_v50, 920167782  ;;  %v277_v15 = vsel %vm273_vm14, %v257_v57, %v260_v60  ;;  %v279_v17 = vsel %vm275_vm0, %v263_v61, %v278_v31 }
  0x38   :  { %v202_v52 = vsub.s32 %v198_v33, %v201_v58  ;;  %v283_v11 = vsel %vm275_vm0, %v266_v62, %v282_v4  ;;  %v285_v21 = vsel %vm273_vm14, %v263_v61, %v266_v62  ;;  %v286_v3 = vsel %vm276_vm15, %v272_v0, 1326507024 }
  0x39   :  { %vm1780_vm13 = vcmp.lt.s32.totalorder %v1779_v56, 0  ;;  %v284_v25 = vsel %vm274_vm1, %v281_v2, %v283_v11  ;;  %v280_v35 = vsel %vm274_vm1, %v277_v15, %v279_v17  ;;  %v194_v43 = vadd.s32 %v2301_v14, %v2309_v18 }
  0x3a   :  { %v106_v63 = vsel %vm1780_vm13, 0, %v1779_v56  ;;  %v204_v44 = vsub.s32 0, %v202_v52  ;;  %v2345_v28 = vmul.u32.u64.low %v289_v48, %v284_v25  ;;  %v2346_v29 = vmul.u32.u64.high %v289_v48, %v284_v25, %v2345_v28 }
  0x3b   :  { %v107_v59 = vsub.s32 32, %v106_v63  ;;  %v108_v1 = vshll.u32 %v99_v27, %v106_v63  ;;  %v111_v30 = vsub.s32 4294967266, %v106_v63  ;;  %v287_v27 = vsel %vm275_vm0, %v269_v50, %v286_v3 }
  0x3c   :  { %v1782_v12 = vmin.u32 %v204_v44, %v202_v52  ;;  %v288_v33 = vsel %vm274_vm1, %v285_v21, %v287_v27  ;;  %v299_v45 = vadd.s32 1, %v2346_v29  ;;  %v296_v47 = vmul.u32 %v289_v48, %v280_v35 }
  0x3d   :  { %v109_v7 = vshrl.u32 %v91_v46, %v107_v59  ;;  %v112_v8 = vadd.s32 127, %v111_v30  ;;  %v2350_v41 = vmul.u32.u64.low %v289_v48, %v288_v33  ;;  %v2351_v37 = vmul.u32.u64.high %v289_v48, %v288_v33, %v2350_v41 }
  0x3e   :  { %v206_v26 = vclz %v1782_v12  ;;  %vm2363_vm5 = vcmp.le.f32.partialorder %v35_v20, 0.7853982  ;;  %vm140_vm6 = vcmp.lt.s32.totalorder %v2197_v10, 0  ;;  %vm2376_vm7 = vcmp.le.f32.partialorder %v138_v22, 0.7853982 }
  0x3f   :  { %v110_v23 = vor.u32 %v109_v7, %v108_v1  ;;  %v113_v24 = vshll.u32 %v112_v8, 23  ;;  %vm298_vm3 = vc.u32 %v2351_v37, %v2345_v28  ;;  %v121_v8 = vsub.s32 4, %v2305_v16 }
  0x40   :  { %v1783_v34 = vadd.s32 4294967294, %v206_v26  ;;  %v300_v56 = vsel %vm298_vm3, %v299_v45, %v2346_v29  ;;  %v224_v22 = vsub.s32 4, %v2327_v53  ;;  %v297_v17 = vadd.s32 %v2345_v28, %v2351_v37 }
  0x41   :  { %v114_v32 = vor.u32 4788187, %v113_v24  ;;  %v117_v39 = vcvt.s32.f32 %v110_v23  ;;  %v301_v57 = vadd.s32 %v300_v56, %v296_v47  ;;  %v122_v15 = vsel %vm37_vm4, %v121_v8, %v2305_v16 }
  0x42   :  { %vm1784_vm2 = vcmp.lt.s32.totalorder %v1783_v34, 0  ;;  %v225_v21 = vsel %vm140_vm6, %v224_v22, %v2327_v53  ;;  %v124_v24 = vsel %vm2363_vm5, 0, %v122_v15  ;;  %v356_v27 = vsub.f32 0.0, %v2180_v5 }
  0x43   :  { %v115_v38 = vand.u32 2147483647, %v114_v32  ;;  %v209_v40 = vsel %vm1784_vm2, 0, %v1783_v34  ;;  %v302_v14 = vadd.s32 536870912, %v301_v57  ;;  %v227_v16 = vsel %vm2376_vm7, 0, %v225_v21 }
  0x44   :  { %v210_v49 = vsub.s32 32, %v209_v40  ;;  %v211_v51 = vshll.u32 %v202_v52, %v209_v40  ;;  %v214_v54 = vsub.s32 4294967266, %v209_v40  ;;  %v357_v34 = vsub.f32 0.0, %v2185_v6 }
  0x45   :  { %v118_v55 = vmul.f32 %v117_v39, %v115_v38  ;;  %v2359_v48 = vshrl.u32 %v302_v14, 30  ;;  %v128_v35 = vand.u32 3, %v124_v24  ;;  %v358_v39 = vsub.f32 0.0, %v2208_v13 }
  0x46   :  { %v212_v36 = vshrl.u32 %v194_v43, %v210_v49  ;;  %v215_v46 = vadd.s32 127, %v214_v54  ;;  %v359_v43 = vmul.f32 1.442695, %v356_v27  ;;  %v231_v45 = vand.u32 3, %v227_v16 }
  0x47   :  { %v119_v61 = vxor.u32 2147483648, %v118_v55  ;;  %v304_v0 = vshll.u32 %v2359_v48, 30  ;;  %v361_v54 = vmul.f32 1.442695, %v357_v34  ;;  %vm130_vm9 = vcmp.eq.s32.totalorder %v128_v35, 0 }
  0x48   :  { %v213_v58 = vor.u32 %v212_v36, %v211_v51  ;;  %v216_v60 = vshll.u32 %v215_v46, 23  ;;  %vm133_vm10 = vcmp.eq.s32.totalorder %v128_v35, 2  ;;  %vm233_vm11 = vcmp.eq.s32.totalorder %v231_v45, 0 }
  0x49   :  { %v120_v52 = vsel %vm37_vm4, %v119_v61, %v118_v55  ;;  %v305_v1 = vsub.s32 %v301_v57, %v304_v0  ;;  %v368_v55 = vlaneseq  ;;  %v363_v57 = vmul.f32 1.442695, %v358_v39 }
  0x4a   :  { %v217_v18 = vor.u32 4788187, %v216_v60  ;;  %v220_v50 = vcvt.s32.f32 %v213_v58  ;;  %v123_v30 = vsel %vm2363_vm5, %v2194_v9, %v120_v52  ;;  %vm236_vm12 = vcmp.eq.s32.totalorder %v231_v45, 2 }
  0x4b   :  { %v307_v44 = vsub.s32 0, %v305_v1  ;;  %1813 = vcosq.f32 %v123_v30  ;;  %vm129_vm13 = vcmp.lt.s32.totalorder %v128_v35, 2  ;;  %vm2403_vm14 = vcmp.le.f32.partialorder %v241_v42, 0.7853982 }
  0x4c   :  { %v218_v62 = vand.u32 2147483647, %v217_v18  ;;  %1815 = vsinq.f32 %v123_v30  ;;  %vm243_vm15 = vcmp.lt.s32.totalorder %v2219_v19, 0  ;;  %vm232_vm0 = vcmp.lt.s32.totalorder %v231_v45, 2 }
  0x4d   :  { %v1786_v7 = vmin.u32 %v307_v44, %v305_v1  ;;  %vm127_vm1 = vweird.f32 %v2194_v9  ;;  %v369_v52 = vshrl.u32 %v368_v55, 7  ;;  %vm230_vm2 = vweird.f32 %v2197_v10 }
  0x4e   :  { %v221_v59 = vmul.f32 %v220_v50, %v218_v62  ;;  %vm350_vm3 = vcmp.lt.f32.partialorder %v2180_v5, 5.0  ;;  %vm351_vm4 = vcmp.lt.f32.partialorder %v2185_v6, 5.0 }
  0x4f   :  { %v309_v11 = vclz %v1786_v7  ;;  %v2416_v20 = vsub.s32 0, %v369_v52  ;;  %v2418_v9 = vsub.s32 1, %v369_v52  ;;  %v386_v8 = vsub.s32 4, %v369_v52 }
  0x50   :  { %v222_v31 = vxor.u32 2147483648, %v221_v59  ;;  %v394_v22 = vsub.s32 6, %v369_v52  ;;  %v398_v15 = vsub.s32 7, %v369_v52 }
  0x51   :  { %v1787_v12 = vadd.s32 4294967294, %v309_v11  ;;  %v390_v11 = vsub.s32 5, %v369_v52 }
  0x52   :  { %v223_v2 = vsel %vm140_vm6, %v222_v31, %v221_v59  ;;  %v327_v59 = vsub.s32 4, %v2359_v48 }
  0x53   :  { %v226_v4 = vsel %vm2376_vm7, %v2197_v10, %v223_v2  ;;  %vm1788_vm8 = vcmp.lt.s32.totalorder %v1787_v12, 0  ;;  %v2420_v2 = vsub.s32 2, %v369_v52 }
  0x54   :  { %1817 = vcosq.f32 %v226_v4  ;;  %v312_v23 = vsel %vm1788_vm8, 0, %v1787_v12  ;;  %v328_v10 = vsel %vm243_vm15, %v327_v59, %v2359_v48  ;;  %vm333_vm8 = vweird.f32 %v2219_v19 }
  0x55   :  { %1819 = vsinq.f32 %v226_v4  ;;  %v313_v25 = vsub.s32 32, %v312_v23  ;;  %v314_v3 = vshll.u32 %v305_v1, %v312_v23  ;;  %v317_v26 = vsub.s32 4294967266, %v312_v23  ;;  %v1814_v29 = vpop.eup %1813 }
  0x56   :  { %v1816_v33 = vpop.eup %1815  ;;  %v134_v47 = vxor.u32 2147483648, %v1814_v29  ;;  %1821 = vpow2.f32 %v359_v43  ;;  %v2422_v4 = vsub.s32 3, %v369_v52  ;;  %v330_v23 = vsel %vm2403_vm14, 0, %v328_v10 }
  0x57   :  { %v315_v32 = vshrl.u32 %v297_v17, %v313_v25  ;;  %v318_v28 = vadd.s32 127, %v317_v26  ;;  %v131_v40 = vxor.u32 2147483648, %v1816_v33  ;;  %1823 = vpow2.f32 %v361_v54 }
  0x58   :  { %v135_v60 = vsel %vm133_vm10, %v134_v47, %v1816_v33  ;;  %1825 = vpow2.f32 %v363_v57  ;;  %v2453_v33 = vand.u32 3, %v330_v23 }
  0x59   :  { %v316_v41 = vor.u32 %v315_v32, %v314_v3  ;;  %v319_v37 = vshll.u32 %v318_v28, 23  ;;  %v132_v58 = vsel %vm130_vm9, %v1814_v29, %v131_v40  ;;  %vm352_vm9 = vcmp.lt.f32.partialorder %v2208_v13, 5.0 }
  0x5a   :  { %v136_v63 = vsel %vm129_vm13, %v132_v58, %v135_v60  ;;  %vm336_vm5 = vcmp.eq.s32.totalorder %v2453_v33, 0  ;;  %vm339_vm6 = vcmp.eq.s32.totalorder %v2453_v33, 2  ;;  %vm335_vm7 = vcmp.lt.s32.totalorder %v2453_v33, 2 }
  0x5b   :  { %v320_v49 = vor.u32 4788187, %v319_v37  ;;  %v323_v51 = vcvt.s32.f32 %v316_v41  ;;  %v137_v30 = vsel %vm127_vm1, nan, %v136_v63 }
  0x5c   :  { %v344_v7 = vadd.f32 1.0, %v137_v30 }
  0x5d   :  { %v321_v56 = vand.u32 2147483647, %v320_v49 }
  0x5e   :  { %v1818_v53 = vpop.eup %1817  ;;  %v347_v3 = vmul.f32 0.5, %v344_v7 }
  0x5f   :  { %v1820_v38 = vpop.eup %1819  ;;  %v237_v46 = vxor.u32 2147483648, %v1818_v53  ;;  %v324_v61 = vmul.f32 %v323_v51, %v321_v56 }
  0x60   :  { %v234_v36 = vxor.u32 2147483648, %v1820_v38  ;;  %v1822_v44 = vpop.eup %1821  ;;  %v353_v45 = vsel %vm350_vm3, %v347_v3, 0.0 }
  0x61   :  { %v238_v50 = vsel %vm236_vm12, %v237_v46, %v1820_v38  ;;  %v325_v62 = vxor.u32 2147483648, %v324_v61  ;;  %v1824_v12 = vpop.eup %1823  ;;  %v2428_v21 = vrot.slane %v1822_v44, %v2416_v20  ;;  %v2433_v24 = vrot.slane %v1822_v44, %v2418_v9 }
  0x62   :  { %v235_v18 = vsel %vm233_vm11, %v1818_v53, %v234_v36  ;;  %v2436_v25 = vrot.slane %v1822_v44, %v2420_v2  ;;  %v2439_v48 = vrot.slane %v1822_v44, %v2422_v4  ;;  %v1826_v26 = vpop.eup %1825  ;;  %v2441_v27 = vrot.slane %v1822_v44, %v386_v8 }
  0x63   :  { %v326_v0 = vsel %vm243_vm15, %v325_v62, %v324_v61  ;;  %v239_v42 = vsel %vm232_vm0, %v235_v18, %v238_v50  ;;  %3998 = vst [vmem:[#allocation5_spill] sm:$0xff] %v2428_v21  ;;  %3999 = vst [vmem:[#allocation6_spill] sm:$0xff] %v2433_v24  ;;  %v2443_v29 = vrot.slane %v1822_v44, %v390_v11 }
  0x64   :  { %v329_v1 = vsel %vm2403_vm14, %v2219_v19, %v326_v0  ;;  %v240_v31 = vsel %vm230_vm2, nan, %v239_v42  ;;  %4000 = vst [vmem:[#allocation7_spill] sm:$0xff] %v2436_v25  ;;  %4001 = vst [vmem:[#allocation8_spill] sm:$0xff] %v2439_v48  ;;  %v2445_v16 = vrot.slane %v1822_v44, %v394_v22  ;;  %v2448_v32 = vrot.slane %v1822_v44, %v398_v15 }
  0x65   :  { %1827 = vcosq.f32 %v329_v1  ;;  %v345_v17 = vadd.f32 1.0, %v240_v31  ;;  %4002 = vst [vmem:[#allocation9_spill] sm:$0xff] %v2441_v27  ;;  %4003 = vst [vmem:[#allocation10_spill] sm:$0xff] %v2443_v29  ;;  %v2451_v28 = vrot.slane %v1824_v12, %v2416_v20  ;;  %v2456_v53 = vrot.slane %v1824_v12, %v2418_v9 }
  0x66   :  { %1829 = vsinq.f32 %v329_v1  ;;  %4004 = vst [vmem:[#allocation11_spill] sm:$0xff] %v2445_v16  ;;  %4005 = vst [vmem:[#allocation12_spill] sm:$0xff] %v2448_v32  ;;  %v2459_v41 = vrot.slane %v1824_v12, %v2420_v2  ;;  %v2462_v37 = vrot.slane %v1824_v12, %v2422_v4  ;;  %v2465_v38 = vrot.slane %v1824_v12, %v386_v8 }
  0x67   :  { %4006 = vst [vmem:[#allocation13_spill] sm:$0xff] %v2451_v28  ;;  %v348_v34 = vmul.f32 0.5, %v345_v17  ;;  %4007 = vst [vmem:[#allocation14_spill] sm:$0xff] %v2456_v53  ;;  %v2467_v39 = vrot.slane %v1824_v12, %v390_v11  ;;  %v2469_v43 = vrot.slane %v1824_v12, %v394_v22  ;;  %v2471_v40 = vrot.slane %v1824_v12, %v398_v15 }
  0x68   :  { %4008 = vst [vmem:[#allocation15_spill] sm:$0xff] %v2459_v41  ;;  %4009 = vst [vmem:[#allocation16_spill] sm:$0xff] %v2462_v37  ;;  %v2474_v47 = vrot.slane %v1826_v26, %v2416_v20  ;;  %v2477_v49 = vrot.slane %v1826_v26, %v2418_v9  ;;  %v2480_v51 = vrot.slane %v1826_v26, %v2420_v2 }
  0x69   :  { %4010 = vst [vmem:[#allocation17_spill] sm:$0xff] %v2465_v38  ;;  %4011 = vst [vmem:[#allocation18_spill] sm:$0xff] %v2467_v39  ;;  %v2483_v6 = vrot.slane %v1826_v26, %v2422_v4  ;;  %v354_v54 = vsel %vm351_vm4, %v348_v34, 0.0  ;;  %v2488_v46 = vrot.slane %v353_v45, %v2416_v20  ;;  %v2491_v56 = vrot.slane %v353_v45, %v2418_v9 }
  0x6a   :  { %4012 = vst [vmem:[#allocation19_spill] sm:$0xff] %v2469_v43  ;;  %4013 = vst [vmem:[#allocation20_spill] sm:$0xff] %v2471_v40  ;;  %v2494_v57 = vrot.slane %v353_v45, %v2420_v2  ;;  %v2497_v58 = vrot.slane %v353_v45, %v2422_v4  ;;  %v2499_v60 = vrot.slane %v353_v45, %v386_v8 }
  0x6b   :  { %4014 = vst [vmem:[#allocation21_spill] sm:$0xff] %v2474_v47  ;;  %4015 = vst [vmem:[#allocation22_spill] sm:$0xff] %v2477_v49  ;;  %v2501_v61 = vrot.slane %v353_v45, %v390_v11  ;;  %v2503_v18 = vrot.slane %v353_v45, %v394_v22  ;;  %v2505_v50 = vrot.slane %v353_v45, %v398_v15 }
  0x6c   :  { %4016 = vst [vmem:[#allocation23_spill] sm:$0xff] %v2480_v51  ;;  %4017 = vst [vmem:[#allocation24_spill] sm:$0xff] %v2483_v6  ;;  %v2508_v62 = vrot.slane %v354_v54, %v2416_v20  ;;  %v2511_v63 = vrot.slane %v354_v54, %v2418_v9  ;;  %v2514_v52 = vrot.slane %v354_v54, %v2420_v2 }
  0x6d   :  { %4018 = vst [vmem:[#allocation25_spill] sm:$0xff] %v2488_v46  ;;  %4019 = vst [vmem:[#allocation26_spill] sm:$0xff] %v2491_v56  ;;  %v2517_v0 = vrot.slane %v354_v54, %v2422_v4  ;;  %v2519_v42 = vrot.slane %v354_v54, %v386_v8  ;;  %v2521_v59 = vrot.slane %v354_v54, %v390_v11 }
  0x6e   :  { %4020 = vst [vmem:[#allocation27_spill] sm:$0xff] %v2494_v57  ;;  %4021 = vst [vmem:[#allocation28_spill] sm:$0xff] %v2497_v58  ;;  %v2531_v31 = vrot.slane %v354_v54, %v394_v22  ;;  %v2533_v44 = vrot.slane %v354_v54, %v398_v15 }
  0x6f   :  { %v1828_v35 = vpop.eup %1827  ;;  %4022 = vst [vmem:[#allocation29_spill] sm:$0xff] %v2499_v60  ;;  %4023 = vst [vmem:[#allocation30_spill] sm:$0xff] %v2501_v61 }
  0x70   :  { %v1830_v5 = vpop.eup %1829  ;;  %v340_v36 = vxor.u32 2147483648, %v1828_v35  ;;  %4024 = vst [vmem:[#allocation31_spill] sm:$0xff] %v2503_v18  ;;  %4025 = vst [vmem:[#allocation32_spill] sm:$0xff] %v2505_v50 }
  0x71   :  { %v337_v55 = vxor.u32 2147483648, %v1830_v5  ;;  %4026 = vst [vmem:[#allocation33_spill] sm:$0xff] %v2508_v62  ;;  %4027 = vst [vmem:[#allocation34_spill] sm:$0xff] %v2511_v63 }
  0x72   :  { %4028 = vst [vmem:[#allocation35_spill] sm:$0xff] %v2514_v52  ;;  %4029 = vst [vmem:[#allocation36_spill] sm:$0xff] %v2517_v0  ;;  %v2529_v30 = vsel %vm339_vm6, %v340_v36, %v1830_v5 }
  0x73   :  { %4030 = vst [vmem:[#allocation37_spill] sm:$0xff] %v2519_v42  ;;  %4031 = vst [vmem:[#allocation38_spill] sm:$0xff] %v2521_v59  ;;  %v2525_v1 = vsel %vm336_vm5, %v1828_v35, %v337_v55 }
  0x74   :  { %4032 = vst [vmem:[#allocation39_spill] sm:$0xff] %v2531_v31  ;;  %4033 = vst [vmem:[#allocation40_spill] sm:$0xff] %v2533_v44 }
  0x81   :  { %v481_v14 = vpop.permute.xlu1 %480  ;;  %v471_v35 = vpop.permute.xlu0 %470 }
  0x82   :  { %v2536_v10 = vsub.f32 %v2428_v21, %v481_v14  ;;  %v2539_v7 = vsub.f32 %v2433_v24, %v481_v14  ;;  %v2542_v8 = vsub.f32 %v2436_v25, %v481_v14  ;;  %v2545_v11 = vsub.f32 %v2439_v48, %v481_v14 }
  0x83   :  { %v2548_v12 = vsub.f32 %v2441_v27, %v481_v14  ;;  %v2551_v22 = vsub.f32 %v2443_v29, %v481_v14  ;;  %v2554_v15 = vsub.f32 %v2445_v16, %v481_v14  ;;  %v2557_v17 = vsub.f32 %v2448_v32, %v481_v14 }
  0x84   :  { %4034 = vst [vmem:[#allocation41_spill] sm:$0xff] %v2542_v8  ;;  %4035 = vst [vmem:[#allocation42_spill] sm:$0xff] %v2545_v11  ;;  %v2560_v23 = vsub.f32 %v2451_v28, %v481_v14  ;;  %v2563_v3 = vsub.f32 %v2456_v53, %v481_v14  ;;  %v2566_v26 = vsub.f32 %v2459_v41, %v481_v14 }
  0x85   :  { %4036 = vst [vmem:[#allocation43_spill] sm:$0xff] %v2548_v12  ;;  %4037 = vst [vmem:[#allocation44_spill] sm:$0xff] %v2551_v22  ;;  %v2569_v34 = vsub.f32 %v2462_v37, %v481_v14  ;;  %v2572_v5 = vsub.f32 %v2465_v38, %v481_v14  ;;  %v2575_v45 = vsub.f32 %v2467_v39, %v481_v14  ;;  %v2631_v61 = vpop.permute.xlu1 %485 }
  0x86   :  { %4038 = vst [vmem:[#allocation45_spill] sm:$0xff] %v2554_v15  ;;  %4039 = vst [vmem:[#allocation46_spill] sm:$0xff] %v2557_v17  ;;  %v2578_v54 = vsub.f32 %v2469_v43, %v481_v14  ;;  %v2581_v55 = vsub.f32 %v2471_v40, %v481_v14  ;;  %v2584_v36 = vsub.f32 %v2474_v47, %v481_v14  ;;  %v476_v17 = vpop.permute.xlu0 %475 }
  0x87   :  { %4040 = vst [vmem:[#allocation47_spill] sm:$0xff] %v2560_v23  ;;  %4041 = vst [vmem:[#allocation48_spill] sm:$0xff] %v2563_v3  ;;  %v2587_v44 = vsub.f32 %v2477_v49, %v481_v14  ;;  %v2590_v31 = vsub.f32 %v2480_v51, %v481_v14  ;;  %v2593_v59 = vsub.f32 %v2483_v6, %v481_v14 }
  0x88   :  { %4042 = vst [vmem:[#allocation49_spill] sm:$0xff] %v2566_v26  ;;  %4043 = vst [vmem:[#allocation50_spill] sm:$0xff] %v2569_v34  ;;  %v2596_v42 = vsub.f32 %v2428_v21, %v471_v35  ;;  %v2599_v0 = vsub.f32 %v2433_v24, %v471_v35  ;;  %v2602_v52 = vsub.f32 %v2436_v25, %v471_v35 }
  0x89   :  { %4044 = vst [vmem:[#allocation51_spill] sm:$0xff] %v2572_v5  ;;  %4045 = vst [vmem:[#allocation52_spill] sm:$0xff] %v2575_v45  ;;  %v2605_v63 = vsub.f32 %v2439_v48, %v471_v35  ;;  %v2608_v62 = vsub.f32 %v2441_v27, %v471_v35  ;;  %v2611_v50 = vsub.f32 %v2443_v29, %v471_v35 }
  0x8a   :  { %4046 = vst [vmem:[#allocation53_spill] sm:$0xff] %v2578_v54  ;;  %4047 = vst [vmem:[#allocation54_spill] sm:$0xff] %v2581_v55  ;;  %v2614_v14 = vsub.f32 %v2445_v16, %v471_v35  ;;  %v2623_v18 = vsub.f32 %v2456_v53, %v471_v35  ;;  %v2634_v55 = vsub.f32 %v2465_v38, %v471_v35 }
  0x8b   :  { %4048 = vst [vmem:[#allocation55_spill] sm:$0xff] %v2584_v36  ;;  %4049 = vst [vmem:[#allocation56_spill] sm:$0xff] %v2587_v44  ;;  %v2626_v44 = vsub.f32 %v2459_v41, %v471_v35  ;;  %v2629_v36 = vsub.f32 %v2462_v37, %v471_v35  ;;  %v2637_v54 = vsub.f32 %v2467_v39, %v471_v35 }
  0x8c   :  { %4050 = vst [vmem:[#allocation57_spill] sm:$0xff] %v2590_v31  ;;  %4051 = vst [vmem:[#allocation58_spill] sm:$0xff] %v2593_v59  ;;  %v2617_v59 = vsub.f32 %v2448_v32, %v471_v35  ;;  %v2620_v31 = vsub.f32 %v2451_v28, %v471_v35  ;;  %v2640_v60 = vsub.f32 %v2469_v43, %v471_v35 }
  0x8d   :  { %4052 = vst [vmem:[#allocation59_spill] sm:$0xff] %v2631_v61  ;;  %v2643_v45 = vsub.f32 %v2471_v40, %v471_v35  ;;  %v2646_v5 = vsub.f32 %v2474_v47, %v471_v35  ;;  %v2649_v58 = vsub.f32 %v2477_v49, %v471_v35  ;;  %v2652_v34 = vsub.f32 %v2480_v51, %v471_v35 }
  0x8e   :  { %v2655_v26 = vsub.f32 %v2483_v6, %v471_v35  ;;  %v2659_v57 = vsub.f32 %v2428_v21, %v2631_v61  ;;  %v2663_v3 = vsub.f32 %v2433_v24, %v2631_v61  ;;  %v2667_v23 = vsub.f32 %v2436_v25, %v2631_v61 }
  0x8f   :  { %v2671_v56 = vsub.f32 %v2439_v48, %v2631_v61  ;;  %v2676_v35 = vsub.f32 %v2441_v27, %v2631_v61  ;;  %v2713_v15 = vsub.f32 %v2467_v39, %v2631_v61  ;;  %v2737_v46 = vsub.f32 %v2439_v48, %v476_v17 }
  0x90   :  { %4053 = vst [vmem:[#allocation60_spill] sm:$0xff] %v2659_v57  ;;  %4054 = vst [vmem:[#allocation61_spill] sm:$0xff] %v2663_v3  ;;  %v2680_v57 = vsub.f32 %v2443_v29, %v2631_v61  ;;  %v2684_v3 = vsub.f32 %v2445_v16, %v2631_v61 }
  0x91   :  { %4055 = vst [vmem:[#allocation62_spill] sm:$0xff] %v2667_v23  ;;  %4056 = vst [vmem:[#allocation63_spill] sm:$0xff] %v2671_v56  ;;  %v2688_v23 = vsub.f32 %v2448_v32, %v2631_v61  ;;  %v2693_v56 = vsub.f32 %v2451_v28, %v2631_v61 }
  0x92   :  { %4057 = vst [vmem:[#allocation64_spill] sm:$0xff] %v2676_v35  ;;  %4058 = vst [vmem:[#allocation65_spill] sm:$0xff] %v2680_v57  ;;  %v2697_v35 = vsub.f32 %v2456_v53, %v2631_v61  ;;  %v2701_v57 = vsub.f32 %v2459_v41, %v2631_v61 }
  0x93   :  { %4059 = vst [vmem:[#allocation66_spill] sm:$0xff] %v2684_v3  ;;  %4060 = vst [vmem:[#allocation67_spill] sm:$0xff] %v2688_v23  ;;  %v2705_v3 = vsub.f32 %v2462_v37, %v2631_v61  ;;  %v2709_v23 = vsub.f32 %v2465_v38, %v2631_v61 }
  0x94   :  { %4061 = vst [vmem:[#allocation68_spill] sm:$0xff] %v2693_v56  ;;  %4062 = vst [vmem:[#allocation69_spill] sm:$0xff] %v2697_v35  ;;  %v2717_v56 = vsub.f32 %v2469_v43, %v2631_v61  ;;  %v2721_v35 = vsub.f32 %v2471_v40, %v2631_v61 }
  0x95   :  { %4063 = vst [vmem:[#allocation70_spill] sm:$0xff] %v2701_v57  ;;  %4064 = vst [vmem:[#allocation71_spill] sm:$0xff] %v2705_v3  ;;  %v2725_v57 = vsub.f32 %v2474_v47, %v2631_v61  ;;  %v2728_v3 = vsub.f32 %v2428_v21, %v476_v17  ;;  %v2748_v61 = vpop.permute.xlu1 %495 }
  0x96   :  { %4065 = vst [vmem:[#allocation72_spill] sm:$0xff] %v2709_v23  ;;  %4066 = vst [vmem:[#allocation73_spill] sm:$0xff] %v2713_v15  ;;  %v2731_v23 = vsub.f32 %v2433_v24, %v476_v17  ;;  %v2734_v15 = vsub.f32 %v2436_v25, %v476_v17 }
  0x97   :  { %4067 = vst [vmem:[#allocation74_spill] sm:$0xff] %v2717_v56  ;;  %4068 = vst [vmem:[#allocation75_spill] sm:$0xff] %v2721_v35  ;;  %v2740_v56 = vsub.f32 %v2441_v27, %v476_v17  ;;  %v2743_v35 = vsub.f32 %v2443_v29, %v476_v17 }
  0x98   :  { %4069 = vst [vmem:[#allocation76_spill] sm:$0xff] %v2725_v57  ;;  %4070 = vst [vmem:[#allocation77_spill] sm:$0xff] %v2728_v3  ;;  %v2746_v57 = vsub.f32 %v2445_v16, %v476_v17  ;;  %v2751_v3 = vsub.f32 %v2448_v32, %v476_v17 }
  0x99   :  { %4071 = vst [vmem:[#allocation78_spill] sm:$0xff] %v2731_v23  ;;  %4072 = vst [vmem:[#allocation79_spill] sm:$0xff] %v2734_v15  ;;  %v2754_v23 = vsub.f32 %v2451_v28, %v476_v17  ;;  %v2757_v15 = vsub.f32 %v2456_v53, %v476_v17 }
  0x9a   :  { %4073 = vst [vmem:[#allocation80_spill] sm:$0xff] %v2737_v46  ;;  %4074 = vst [vmem:[#allocation81_spill] sm:$0xff] %v2740_v56  ;;  %v2760_v46 = vsub.f32 %v2459_v41, %v476_v17  ;;  %v2762_v56 = vpop.permute.xlu0 %490 }
  0x9b   :  { %4075 = vst [vmem:[#allocation82_spill] sm:$0xff] %v2743_v35  ;;  %4076 = vst [vmem:[#allocation83_spill] sm:$0xff] %v2746_v57  ;;  %v2765_v35 = vsub.f32 %v2462_v37, %v476_v17  ;;  %v2768_v57 = vsub.f32 %v2465_v38, %v476_v17  ;;  %v2856_v33 = vsub.f32 %v2469_v43, %v2762_v56 }
  0x9c   :  { %4077 = vst [vmem:[#allocation84_spill] sm:$0xff] %v2748_v61  ;;  %4078 = vst [vmem:[#allocation85_spill] sm:$0xff] %v2751_v3  ;;  %v2771_v61 = vsub.f32 %v2467_v39, %v476_v17  ;;  %v2774_v3 = vsub.f32 %v2469_v43, %v476_v17 }
  0x9d   :  { %4079 = vst [vmem:[#allocation86_spill] sm:$0xff] %v2754_v23  ;;  %4080 = vst [vmem:[#allocation87_spill] sm:$0xff] %v2757_v15  ;;  %v2777_v23 = vsub.f32 %v2471_v40, %v476_v17  ;;  %v2780_v15 = vsub.f32 %v2474_v47, %v476_v17 }
  0x9e   :  { %4081 = vst [vmem:[#allocation88_spill] sm:$0xff] %v2760_v46  ;;  %4082 = vst [vmem:[#allocation89_spill] sm:$0xff] %v2762_v56  ;;  %v2783_v46 = vsub.f32 %v2477_v49, %v476_v17 }
  0x9f   :  { %4083 = vst [vmem:[#allocation90_spill] sm:$0xff] %v2765_v35  ;;  %4084 = vst [vmem:[#allocation91_spill] sm:$0xff] %v2768_v57  ;;  %v2786_v35 = vsub.f32 %v2480_v51, %v476_v17  ;;  %v2789_v57 = vsub.f32 %v2483_v6, %v476_v17  ;;  %v2806_v51 = vsub.f32 %v2439_v48, %v2762_v56 }
  0xa0   :  { %4085 = vst [vmem:[#allocation92_spill] sm:$0xff] %v2771_v61  ;;  %4086 = vst [vmem:[#allocation93_spill] sm:$0xff] %v2774_v3  ;;  %v2793_v61 = vsub.f32 %v2428_v21, %v2762_v56  ;;  %v2797_v3 = vsub.f32 %v2433_v24, %v2762_v56  ;;  %v2810_v17 = vsub.f32 %v2441_v27, %v2762_v56 }
  0xa1   :  { %4087 = vst [vmem:[#allocation94_spill] sm:$0xff] %v2777_v23  ;;  %4088 = vst [vmem:[#allocation95_spill] sm:$0xff] %v2780_v15  ;;  %v2801_v15 = vsub.f32 %v2436_v25, %v2762_v56  ;;  %v2814_v21 = vsub.f32 %v2443_v29, %v2762_v56  ;;  %v2818_v24 = vsub.f32 %v2445_v16, %v2762_v56 }
  0xa2   :  { %4089 = vst [vmem:[#allocation96_spill] sm:$0xff] %v2783_v46  ;;  %4090 = vst [vmem:[#allocation97_spill] sm:$0xff] %v2786_v35  ;;  %v2822_v25 = vsub.f32 %v2448_v32, %v2762_v56  ;;  %v2826_v48 = vsub.f32 %v2451_v28, %v2762_v56  ;;  %v2830_v27 = vsub.f32 %v2456_v53, %v2762_v56 }
  0xa3   :  { %4091 = vst [vmem:[#allocation98_spill] sm:$0xff] %v2789_v57  ;;  %4092 = vst [vmem:[#allocation99_spill] sm:$0xff] %v2793_v61  ;;  %v342_v29 = vsel %vm335_vm7, %v2525_v1, %v2529_v30  ;;  %v2838_v16 = vsub.f32 %v2459_v41, %v2762_v56  ;;  %v2842_v32 = vsub.f32 %v2462_v37, %v2762_v56 }
  0xa4   :  { %4093 = vst [vmem:[#allocation100_spill] sm:$0xff] %v2797_v3  ;;  %4094 = vst [vmem:[#allocation101_spill] sm:$0xff] %v2801_v15  ;;  %v2846_v28 = vsub.f32 %v2465_v38, %v2762_v56  ;;  %v343_v53 = vsel %vm333_vm8, nan, %v342_v29  ;;  %v2860_v1 = vsub.f32 %v2471_v40, %v2762_v56  ;;  %v2864_v38 = vsub.f32 %v2474_v47, %v2762_v56 }
  0xa5   :  { %4095 = vst [vmem:[#allocation102_spill] sm:$0xff] %v2806_v51  ;;  %4096 = vst [vmem:[#allocation103_spill] sm:$0xff] %v2810_v17  ;;  %v646_v17 = vpop.permute.xlu1 %645  ;;  %v346_v30 = vadd.f32 1.0, %v343_v53 }
  0xa6   :  { %4097 = vst [vmem:[#allocation104_spill] sm:$0xff] %v2814_v21  ;;  %4098 = vst [vmem:[#allocation105_spill] sm:$0xff] %v2818_v24  ;;  %v678_v19 = vmul.f32 %v646_v17, %v2596_v42  ;;  %v679_v29 = vmul.f32 %v646_v17, %v2599_v0  ;;  %v681_v37 = vmul.f32 %v646_v17, %v2605_v63 }
  0xa7   :  { %4099 = vst [vmem:[#allocation106_spill] sm:$0xff] %v2822_v25  ;;  %4100 = vst [vmem:[#allocation107_spill] sm:$0xff] %v2826_v48  ;;  %v682_v43 = vmul.f32 %v646_v17, %v2608_v62  ;;  %v683_v41 = vmul.f32 %v646_v17, %v2611_v50  ;;  %v684_v40 = vmul.f32 %v646_v17, %v2614_v14 }
  0xa8   :  { %4101 = vst [vmem:[#allocation108_spill] sm:$0xff] %v2830_v27  ;;  %4102 = vst [vmem:[#allocation109_spill] sm:$0xff] %v2838_v16  ;;  %v2852_v27 = vsub.f32 %v2467_v39, %v2762_v56  ;;  %v680_v39 = vmul.f32 %v646_v17, %v2602_v52  ;;  %v685_v53 = vmul.f32 %v646_v17, %v2617_v59  ;;  %v818_v21 = vsub.f32 0.0, %v678_v19 }
  0xa9   :  { %4103 = vst [vmem:[#allocation110_spill] sm:$0xff] %v2842_v32  ;;  %4104 = vst [vmem:[#allocation111_spill] sm:$0xff] %v2846_v28  ;;  %v686_v47 = vmul.f32 %v646_v17, %v2620_v31  ;;  %v690_v28 = vmul.f32 %v646_v17, %v2634_v55  ;;  %v691_v32 = vmul.f32 %v646_v17, %v2637_v54  ;;  %v819_v51 = vsub.f32 0.0, %v679_v29 }
  0xaa   :  { %4105 = vst [vmem:[#allocation112_spill] sm:$0xff] %v2852_v27  ;;  %4106 = vst [vmem:[#allocation113_spill] sm:$0xff] %v2856_v33  ;;  %v688_v33 = vmul.f32 %v646_v17, %v2626_v44  ;;  %v689_v27 = vmul.f32 %v646_v17, %v2629_v36  ;;  %v692_v16 = vmul.f32 %v646_v17, %v2640_v60  ;;  %v820_v15 = vsub.f32 0.0, %v680_v39 }
  0xab   :  { %4107 = vst [vmem:[#allocation114_spill] sm:$0xff] %v2860_v1  ;;  %4108 = vst [vmem:[#allocation115_spill] sm:$0xff] %v2864_v38  ;;  %v349_v1 = vmul.f32 0.5, %v346_v30  ;;  %v687_v38 = vmul.f32 %v646_v17, %v2623_v18  ;;  %v693_v48 = vmul.f32 %v646_v17, %v2643_v45  ;;  %v694_v30 = vmul.f32 %v646_v17, %v2646_v5 }
  0xac   :  { %v695_v25 = vmul.f32 %v646_v17, %v2649_v58  ;;  %v696_v24 = vmul.f32 %v646_v17, %v2652_v34  ;;  %v697_v61 = vmul.f32 %v646_v17, %v2655_v26  ;;  %v821_v6 = vsub.f32 0.0, %v681_v37 }
  0xad   :  { %v2887_v3 = vsel %vm352_vm9, %v349_v1, 0.0  ;;  %v822_v57 = vsub.f32 0.0, %v682_v43  ;;  %v823_v35 = vsub.f32 0.0, %v683_v41  ;;  %v824_v46 = vsub.f32 0.0, %v684_v40 }
  0xae   :  { %v825_v23 = vsub.f32 0.0, %v685_v53  ;;  %v826_v49 = vsub.f32 0.0, %v686_v47  ;;  %v827_v56 = vsub.f32 0.0, %v687_v38  ;;  %v828_v22 = vsub.f32 0.0, %v688_v33  ;;  %v4112_v33 = vld [vmem:[#allocation42_spill] sm:$0xff] }
  0xaf   :  { %v829_v12 = vsub.f32 0.0, %v689_v27  ;;  %v830_v11 = vsub.f32 0.0, %v690_v28  ;;  %v831_v8 = vsub.f32 0.0, %v691_v32  ;;  %v958_v19 = vmul.f32 %v818_v21, %v2596_v42 }
  0xb0   :  { %v959_v39 = vmul.f32 %v819_v51, %v2599_v0  ;;  %v960_v13 = vmul.f32 %v820_v15, %v2602_v52  ;;  %v832_v1 = vsub.f32 0.0, %v692_v16  ;;  %v833_v29 = vsub.f32 0.0, %v693_v48 }
  0xb1   :  { %v834_v17 = vsub.f32 0.0, %v694_v30  ;;  %v961_v37 = vmul.f32 %v821_v6, %v2605_v63  ;;  %v835_v41 = vsub.f32 0.0, %v695_v25  ;;  %v836_v43 = vsub.f32 0.0, %v696_v24 }
  0xb2   :  { %v837_v40 = vsub.f32 0.0, %v697_v61  ;;  %v962_v38 = vmul.f32 %v822_v57, %v2608_v62  ;;  %v963_v27 = vmul.f32 %v823_v35, %v2611_v50  ;;  %v964_v32 = vmul.f32 %v824_v46, %v2614_v14  ;;  %v4111_v14 = vld [vmem:[#allocation41_spill] sm:$0xff] }
  0xb3   :  { %v965_v21 = vmul.f32 %v825_v23, %v2617_v59  ;;  %v966_v28 = vmul.f32 %v826_v49, %v2620_v31  ;;  %v967_v47 = vmul.f32 %v827_v56, %v2623_v18  ;;  %v1098_v16 = vmul.f32 1.442695, %v958_v19  ;;  %v656_v23 = vpop.permute.xlu1 %655 }
  0xb4   :  { %v1100_v48 = vmul.f32 1.442695, %v959_v39  ;;  %v1102_v51 = vmul.f32 1.442695, %v960_v13  ;;  %v968_v6 = vmul.f32 %v828_v22, %v2626_v44  ;;  %v969_v24 = vmul.f32 %v829_v12, %v2629_v36  ;;  %v4115_v39 = vld [vmem:[#allocation25_spill] sm:$0xff] }
  0xb5   :  { %v970_v25 = vmul.f32 %v830_v11, %v2634_v55  ;;  %v1104_v57 = vmul.f32 1.442695, %v961_v37  ;;  %v971_v61 = vmul.f32 %v831_v8, %v2637_v54  ;;  %v972_v46 = vmul.f32 %v832_v1, %v2640_v60  ;;  %v4116_v1 = vld [vmem:[#allocation45_spill] sm:$0xff] }
  0xb6   :  { %1831 = vpow2.f32 %v1098_v16  ;;  %v1106_v50 = vmul.f32 1.442695, %v962_v38  ;;  %v973_v49 = vmul.f32 %v833_v29, %v2643_v45  ;;  %v974_v56 = vmul.f32 %v834_v17, %v2646_v5  ;;  %v4117_v17 = vld [vmem:[#allocation46_spill] sm:$0xff]  ;;  %v4119_v38 = vld [vmem:[#allocation47_spill] sm:$0xff] }
  0xb7   :  { %1833 = vpow2.f32 %v1100_v48  ;;  %v1108_v18 = vmul.f32 1.442695, %v963_v27  ;;  %v975_v62 = vmul.f32 %v835_v41, %v2649_v58  ;;  %v976_v63 = vmul.f32 %v836_v43, %v2652_v34  ;;  %v4118_v43 = vld [vmem:[#allocation26_spill] sm:$0xff]  ;;  %v4122_v48 = vld [vmem:[#allocation49_spill] sm:$0xff] }
  0xb8   :  { %1835 = vpow2.f32 %v1102_v51  ;;  %v1110_v52 = vmul.f32 1.442695, %v964_v32  ;;  %v977_v0 = vmul.f32 %v837_v40, %v2655_v26  ;;  %v1112_v42 = vmul.f32 1.442695, %v965_v21  ;;  %v4120_v32 = vld [vmem:[#allocation48_spill] sm:$0xff] }
  0xb9   :  { %1837 = vpow2.f32 %v1104_v57  ;;  %v2912_v60 = vrot.slane %v2887_v3, %v2416_v20  ;;  %v1114_v59 = vmul.f32 1.442695, %v966_v28  ;;  %v1116_v31 = vmul.f32 1.442695, %v967_v47  ;;  %v4121_v47 = vld [vmem:[#allocation27_spill] sm:$0xff]  ;;  %v4124_v57 = vld [vmem:[#allocation28_spill] sm:$0xff] }
  0xba   :  { %1839 = vpow2.f32 %v1106_v50  ;;  %v1118_v44 = vmul.f32 1.442695, %v968_v6  ;;  %v1120_v8 = vmul.f32 1.442695, %v969_v24  ;;  %v1122_v11 = vmul.f32 1.442695, %v970_v25 }
  0xbb   :  { %4109 = vst [vmem:[#allocation116_spill] sm:$0xff] %v2912_v60  ;;  %1841 = vpow2.f32 %v1108_v18  ;;  %v1124_v58 = vmul.f32 1.442695, %v971_v61  ;;  %v1126_v12 = vmul.f32 1.442695, %v972_v46  ;;  %v2916_v20 = vrot.slane %v2887_v3, %v2418_v9  ;;  %v4123_v6 = vld [vmem:[#allocation50_spill] sm:$0xff] }
  0xbc   :  { %1843 = vpow2.f32 %v1110_v52  ;;  %v1128_v22 = vmul.f32 1.442695, %v973_v49  ;;  %v1130_v15 = vmul.f32 1.442695, %v974_v56  ;;  %v1132_v26 = vmul.f32 1.442695, %v975_v62 }
  0xbd   :  { %1845 = vpow2.f32 %v1112_v42  ;;  %v1134_v34 = vmul.f32 1.442695, %v976_v63  ;;  %v1136_v5 = vmul.f32 1.442695, %v977_v0  ;;  %4110 = vst [vmem:[#allocation117_spill] sm:$0xff] %v2916_v20  ;;  %v2920_v45 = vrot.slane %v2887_v3, %v2420_v2  ;;  %v4113_v2 = vld [vmem:[#allocation43_spill] sm:$0xff] }
  0xbe   :  { %1847 = vpow2.f32 %v1114_v59  ;;  %v2924_v54 = vrot.slane %v2887_v3, %v2422_v4  ;;  %v2927_v55 = vmul.f32 %v656_v23, %v2536_v10  ;;  %v2930_v36 = vmul.f32 %v656_v23, %v2539_v7  ;;  %v4114_v4 = vld [vmem:[#allocation44_spill] sm:$0xff]  ;;  %v4125_v46 = vld [vmem:[#allocation51_spill] sm:$0xff]  ;;  %v4127_v62 = vld [vmem:[#allocation29_spill] sm:$0xff] }
  0xbf   :  { %1849 = vpow2.f32 %v1116_v31  ;;  %v2933_v35 = vmul.f32 %v656_v23, %v4111_v14  ;;  %v2936_v53 = vmul.f32 %v656_v23, %v4112_v33  ;;  %v2939_v30 = vmul.f32 %v656_v23, %v4113_v2  ;;  %v4126_v49 = vld [vmem:[#allocation52_spill] sm:$0xff]  ;;  %v4128_v52 = vld [vmem:[#allocation53_spill] sm:$0xff]  ;;  %v4129_v42 = vld [vmem:[#allocation54_spill] sm:$0xff] }
  0xc0   :  { %v1832_v9 = vpop.eup %1831  ;;  %1851 = vpow2.f32 %v1118_v44  ;;  %v2942_v3 = vmul.f32 %v656_v23, %v4114_v4  ;;  %v2946_v29 = vmul.f32 %v656_v23, %v4116_v1  ;;  %v2949_v37 = vmul.f32 %v656_v23, %v4117_v17  ;;  %v4130_v44 = vld [vmem:[#allocation30_spill] sm:$0xff] }
  0xc1   :  { %v1834_v19 = vpop.eup %1833  ;;  %1853 = vpow2.f32 %v1120_v8  ;;  %v1481_v13 = vmul.f32 %v1832_v9, %v4115_v39  ;;  %v2953_v27 = vmul.f32 %v656_v23, %v4119_v38  ;;  %v2956_v21 = vmul.f32 %v656_v23, %v4120_v32 }
  0xc2   :  { %v1836_v41 = vpop.eup %1835  ;;  %1855 = vpow2.f32 %v1122_v11  ;;  %v1482_v40 = vmul.f32 %v1834_v19, %v4118_v43  ;;  %v2960_v51 = vmul.f32 %v656_v23, %v4122_v48  ;;  %v2963_v24 = vmul.f32 %v656_v23, %v4123_v6  ;;  %v4131_v11 = vld [vmem:[#allocation55_spill] sm:$0xff] }
  0xc3   :  { %v1838_v28 = vpop.eup %1837  ;;  %1857 = vpow2.f32 %v1124_v58  ;;  %v1483_v16 = vmul.f32 %v1836_v41, %v4121_v47  ;;  %1621 = vst [vmem:[#allocation2] sm:$0xff] %v1481_v13  ;;  %v2967_v50 = vmul.f32 %v656_v23, %v4125_v46  ;;  %v2970_v56 = vmul.f32 %v656_v23, %v4126_v49  ;;  %v4133_v19 = vld [vmem:[#allocation31_spill] sm:$0xff]  ;;  %v4134_v41 = vld [vmem:[#allocation57_spill] sm:$0xff] }
  0xc4   :  { %v1840_v25 = vpop.eup %1839  ;;  %1859 = vpow2.f32 %v1126_v12  ;;  %v1484_v61 = vmul.f32 %v1838_v28, %v4124_v57  ;;  %1622 = vst [vmem:[#allocation2 + $0x8] sm:$0xff] %v1482_v40  ;;  %v2974_v0 = vmul.f32 %v656_v23, %v4128_v52  ;;  %v2977_v59 = vmul.f32 %v656_v23, %v4129_v42  ;;  %v4132_v12 = vld [vmem:[#allocation56_spill] sm:$0xff]  ;;  %v4135_v28 = vld [vmem:[#allocation58_spill] sm:$0xff] }
  0xc5   :  { %v1842_v18 = vpop.eup %1841  ;;  %1861 = vpow2.f32 %v1128_v22  ;;  %v1485_v63 = vmul.f32 %v1840_v25, %v4127_v62  ;;  %1623 = vst [vmem:[#allocation2 + $0x10] sm:$0xff] %v1483_v16  ;;  %v2981_v58 = vmul.f32 %v656_v23, %v4131_v11  ;;  %v2984_v9 = vmul.f32 %v656_v23, %v4132_v12  ;;  %v4136_v25 = vld [vmem:[#allocation32_spill] sm:$0xff]  ;;  %v4138_v57 = vld [vmem:[#allocation34_spill] sm:$0xff] }
  0xc6   :  { %v1844_v31 = vpop.eup %1843  ;;  %1863 = vpow2.f32 %v1130_v15  ;;  %v1486_v8 = vmul.f32 %v1842_v18, %v4130_v44  ;;  %1624 = vst [vmem:[#allocation2 + $0x18] sm:$0xff] %v1484_v61  ;;  %v2988_v40 = vmul.f32 %v656_v23, %v4134_v41  ;;  %v2991_v16 = vmul.f32 %v656_v23, %v4135_v28 }
  0xc7   :  { %v1846_v22 = vpop.eup %1845  ;;  %1865 = vpow2.f32 %v1132_v26  ;;  %v1487_v13 = vmul.f32 %v1844_v31, %v4133_v19  ;;  %1625 = vst [vmem:[#allocation2 + $0x20] sm:$0xff] %v1485_v63  ;;  %v858_v18 = vsub.f32 0.0, %v2927_v55  ;;  %v859_v44 = vsub.f32 0.0, %v2930_v36  ;;  %v4137_v26 = vld [vmem:[#allocation33_spill] sm:$0xff] }
  0xc8   :  { %v1848_v15 = vpop.eup %1847  ;;  %1867 = vpow2.f32 %v1134_v34  ;;  %v1488_v61 = vmul.f32 %v1846_v22, %v4136_v25  ;;  %1626 = vst [vmem:[#allocation2 + $0x28] sm:$0xff] %v1486_v8  ;;  %v860_v63 = vsub.f32 0.0, %v2933_v35  ;;  %v861_v19 = vsub.f32 0.0, %v2936_v53  ;;  %v4139_v22 = vld [vmem:[#allocation35_spill] sm:$0xff] }
  0xc9   :  { %v1850_v62 = vpop.eup %1849  ;;  %1869 = vpow2.f32 %v1136_v5  ;;  %v1489_v31 = vmul.f32 %v1848_v15, %v4137_v26  ;;  %1627 = vst [vmem:[#allocation2 + $0x30] sm:$0xff] %v1487_v13  ;;  %v862_v34 = vsub.f32 0.0, %v2939_v30  ;;  %v863_v8 = vsub.f32 0.0, %v2942_v3  ;;  %v4140_v26 = vld [vmem:[#allocation36_spill] sm:$0xff] }
  0xca   :  { %v1852_v23 = vpop.eup %1851  ;;  %v1490_v47 = vmul.f32 %v1850_v62, %v4138_v57  ;;  %1628 = vst [vmem:[#allocation2 + $0x38] sm:$0xff] %v1488_v61  ;;  %v864_v55 = vsub.f32 0.0, %v2946_v29  ;;  %v865_v13 = vsub.f32 0.0, %v2949_v37  ;;  %v866_v35 = vsub.f32 0.0, %v2953_v27  ;;  %v4141_v57 = vld [vmem:[#allocation37_spill] sm:$0xff] }
  0xcb   :  { %v1854_v36 = vpop.eup %1853  ;;  %v1491_v5 = vmul.f32 %v1852_v23, %v4139_v22  ;;  %1629 = vst [vmem:[#allocation2 + $0x40] sm:$0xff] %v1489_v31  ;;  %v867_v53 = vsub.f32 0.0, %v2956_v21  ;;  %v868_v30 = vsub.f32 0.0, %v2960_v51  ;;  %v869_v3 = vsub.f32 0.0, %v2963_v24  ;;  %v4142_v22 = vld [vmem:[#allocation38_spill] sm:$0xff] }
  0xcc   :  { %v1856_v15 = vpop.eup %1855  ;;  %v1492_v62 = vmul.f32 %v1854_v36, %v4140_v26  ;;  %1630 = vst [vmem:[#allocation2 + $0x48] sm:$0xff] %v1490_v47  ;;  %v870_v29 = vsub.f32 0.0, %v2967_v50  ;;  %v871_v37 = vsub.f32 0.0, %v2970_v56  ;;  %v872_v27 = vsub.f32 0.0, %v2974_v0  ;;  %v4143_v26 = vld [vmem:[#allocation39_spill] sm:$0xff] }
  0xcd   :  { %v1858_v61 = vpop.eup %1857  ;;  %v1493_v23 = vmul.f32 %v1856_v15, %v4141_v57  ;;  %1631 = vst [vmem:[#allocation2 + $0x50] sm:$0xff] %v1491_v5  ;;  %v873_v21 = vsub.f32 0.0, %v2977_v59  ;;  %v874_v47 = vsub.f32 0.0, %v2981_v58  ;;  %v875_v51 = vsub.f32 0.0, %v2984_v9  ;;  %v4144_v57 = vld [vmem:[#allocation40_spill] sm:$0xff] }
  0xce   :  { %v1860_v31 = vpop.eup %1859  ;;  %v1494_v36 = vmul.f32 %v1858_v61, %v4142_v22  ;;  %1632 = vst [vmem:[#allocation2 + $0x58] sm:$0xff] %v1492_v62  ;;  %v998_v24 = vmul.f32 %v858_v18, %v2536_v10  ;;  %v999_v56 = vmul.f32 %v859_v44, %v2539_v7  ;;  %v1000_v0 = vmul.f32 %v860_v63, %v4111_v14 }
  0xcf   :  { %v1862_v50 = vpop.eup %1861  ;;  %v1495_v15 = vmul.f32 %v1860_v31, %v4143_v26  ;;  %1633 = vst [vmem:[#allocation2 + $0x60] sm:$0xff] %v1493_v23  ;;  %v1001_v59 = vmul.f32 %v861_v19, %v4112_v33  ;;  %v876_v58 = vsub.f32 0.0, %v2988_v40  ;;  %v877_v9 = vsub.f32 0.0, %v2991_v16 }
  0xd0   :  { %v1864_v5 = vpop.eup %1863  ;;  %v1496_v61 = vmul.f32 %v1862_v50, %v4144_v57  ;;  %1634 = vst [vmem:[#allocation2 + $0x68] sm:$0xff] %v1494_v36  ;;  %v1002_v10 = vmul.f32 %v862_v34, %v4113_v2  ;;  %v1003_v7 = vmul.f32 %v863_v8, %v4114_v4  ;;  %v1004_v14 = vmul.f32 %v864_v55, %v4116_v1 }
  0xd1   :  { %v1866_v18 = vpop.eup %1865  ;;  %v1497_v62 = vmul.f32 %v1864_v5, %v2912_v60  ;;  %1635 = vst [vmem:[#allocation2 + $0x70] sm:$0xff] %v1495_v15  ;;  %v1005_v33 = vmul.f32 %v865_v13, %v4117_v17  ;;  %v1006_v40 = vmul.f32 %v866_v35, %v4119_v38  ;;  %v1007_v16 = vmul.f32 %v867_v53, %v4120_v32  ;;  %v3036_v17 = vpop.permute.xlu0 %500 }
  0xd2   :  { %v1868_v44 = vpop.eup %1867  ;;  %v1498_v19 = vmul.f32 %v1866_v18, %v2916_v20  ;;  %1636 = vst [vmem:[#allocation2 + $0x78] sm:$0xff] %v1496_v61  ;;  %v1178_v63 = vmul.f32 1.442695, %v998_v24  ;;  %v1180_v23 = vmul.f32 1.442695, %v999_v56  ;;  %4145 = vst [vmem:[#allocation41_spill] sm:$0xff] %v3036_v17  ;;  %v1008_v8 = vmul.f32 %v868_v30, %v4122_v48 }
  0xd3   :  { %v1870_v2 = vpop.eup %1869  ;;  %v1499_v34 = vmul.f32 %v1868_v44, %v2920_v45  ;;  %1637 = vst [vmem:[#allocation2 + $0x80] sm:$0xff] %v1497_v62  ;;  %v1182_v31 = vmul.f32 1.442695, %v1000_v0  ;;  %v1184_v4 = vmul.f32 1.442695, %v1001_v59  ;;  %v1009_v38 = vmul.f32 %v869_v3, %v4123_v6  ;;  %v4146_v3 = vld [vmem:[#allocation89_spill] sm:$0xff] }
  0xd4   :  { %v1500_v1 = vmul.f32 %v1870_v2, %v2924_v54  ;;  %1638 = vst [vmem:[#allocation2 + $0x88] sm:$0xff] %v1498_v19  ;;  %1871 = vpow2.f32 %v1178_v63  ;;  %v1186_v55 = vmul.f32 1.442695, %v1002_v10  ;;  %v1010_v32 = vmul.f32 %v870_v29, %v4125_v46  ;;  %v4147_v29 = vld [vmem:[#allocation22_spill] sm:$0xff]  ;;  %v4149_v59 = vld [vmem:[#allocation77_spill] sm:$0xff]  ;;  %v4152_v18 = vld [vmem:[#allocation80_spill] sm:$0xff] }
  0xd5   :  { %1639 = vst [vmem:[#allocation2 + $0x90] sm:$0xff] %v1499_v34  ;;  %1873 = vpow2.f32 %v1180_v23  ;;  %v1188_v13 = vmul.f32 1.442695, %v1003_v7  ;;  %v1011_v35 = vmul.f32 %v871_v37, %v4126_v49  ;;  %v1012_v53 = vmul.f32 %v872_v27, %v4128_v52  ;;  %v651_v27 = vpop.permute.xlu0 %650  ;;  %v4153_v7 = vld [vmem:[#allocation81_spill] sm:$0xff]  ;;  %v4154_v19 = vld [vmem:[#allocation82_spill] sm:$0xff] }
  0xd6   :  { %1640 = vst [vmem:[#allocation2 + $0x98] sm:$0xff] %v1500_v1  ;;  %1875 = vpow2.f32 %v1182_v31  ;;  %v1190_v36 = vmul.f32 1.442695, %v1004_v14  ;;  %v1013_v24 = vmul.f32 %v873_v21, %v4129_v42  ;;  %v1014_v48 = vmul.f32 %v874_v47, %v4131_v11  ;;  %v4156_v23 = vld [vmem:[#allocation85_spill] sm:$0xff] }
  0xd7   :  { %1877 = vpow2.f32 %v1184_v4  ;;  %v1192_v30 = vmul.f32 1.442695, %v1005_v33  ;;  %v1015_v50 = vmul.f32 %v875_v51, %v4132_v12  ;;  %v1016_v6 = vmul.f32 %v876_v58, %v4134_v41  ;;  %v4157_v4 = vld [vmem:[#allocation86_spill] sm:$0xff] }
  0xd8   :  { %1879 = vpow2.f32 %v1186_v55  ;;  %v1194_v46 = vmul.f32 1.442695, %v1006_v40  ;;  %v3049_v15 = vsub.f32 %v4147_v29, %v4146_v3  ;;  %v1017_v49 = vmul.f32 %v877_v9, %v4135_v28  ;;  %v4150_v28 = vld [vmem:[#allocation78_spill] sm:$0xff]  ;;  %v4151_v9 = vld [vmem:[#allocation79_spill] sm:$0xff]  ;;  %v4171_v29 = vld [vmem:[#allocation96_spill] sm:$0xff] }
  0xd9   :  { %1881 = vpow2.f32 %v1188_v13  ;;  %v1196_v52 = vmul.f32 1.442695, %v1007_v16  ;;  %v1198_v42 = vmul.f32 1.442695, %v1008_v8  ;;  %v1200_v37 = vmul.f32 1.442695, %v1009_v38 }
  0xda   :  { %4148 = vst [vmem:[#allocation42_spill] sm:$0xff] %v3049_v15  ;;  %1883 = vpow2.f32 %v1190_v36  ;;  %v1202_v11 = vmul.f32 1.442695, %v1010_v32  ;;  %v1204_v21 = vmul.f32 1.442695, %v1011_v35  ;;  %v3053_v5 = vmul.f32 %v651_v27, %v4149_v59  ;;  %v4155_v16 = vld [vmem:[#allocation83_spill] sm:$0xff] }
  0xdb   :  { %1885 = vpow2.f32 %v1192_v30  ;;  %v1206_v12 = vmul.f32 1.442695, %v1012_v53  ;;  %v1208_v47 = vmul.f32 1.442695, %v1013_v24  ;;  %v1210_v41 = vmul.f32 1.442695, %v1014_v48 }
  0xdc   :  { %1887 = vpow2.f32 %v1194_v46  ;;  %v1212_v51 = vmul.f32 1.442695, %v1015_v50  ;;  %v1214_v56 = vmul.f32 1.442695, %v1016_v6  ;;  %v1216_v0 = vmul.f32 1.442695, %v1017_v49 }
  0xdd   :  { %1889 = vpow2.f32 %v1196_v52  ;;  %v3056_v61 = vmul.f32 %v651_v27, %v4150_v28  ;;  %v3059_v10 = vmul.f32 %v651_v27, %v4151_v9  ;;  %v3062_v62 = vmul.f32 %v651_v27, %v4152_v18  ;;  %v4158_v55 = vld [vmem:[#allocation27_spill] sm:$0xff]  ;;  %v4160_v35 = vld [vmem:[#allocation88_spill] sm:$0xff]  ;;  %v4162_v30 = vld [vmem:[#allocation90_spill] sm:$0xff] }
  0xde   :  { %v1872_v58 = vpop.eup %1871  ;;  %1891 = vpow2.f32 %v1198_v42  ;;  %v3065_v14 = vmul.f32 %v651_v27, %v4153_v7  ;;  %v3069_v40 = vmul.f32 %v651_v27, %v4154_v19  ;;  %v3072_v63 = vmul.f32 %v651_v27, %v4155_v16  ;;  %v4159_v32 = vld [vmem:[#allocation87_spill] sm:$0xff]  ;;  %v4161_v24 = vld [vmem:[#allocation28_spill] sm:$0xff]  ;;  %v4164_v52 = vld [vmem:[#allocation29_spill] sm:$0xff] }
  0xdf   :  { %v1874_v33 = vpop.eup %1873  ;;  %1893 = vpow2.f32 %v1200_v37  ;;  %v1521_v44 = vmul.f32 %v1872_v58, %v4115_v39  ;;  %v3076_v31 = vmul.f32 %v651_v27, %v4156_v23  ;;  %v3079_v1 = vmul.f32 %v651_v27, %v4157_v4  ;;  %v4163_v6 = vld [vmem:[#allocation91_spill] sm:$0xff]  ;;  %v4165_v37 = vld [vmem:[#allocation92_spill] sm:$0xff]  ;;  %v4175_v3 = vld [vmem:[#allocation34_spill] sm:$0xff] }
  0xe0   :  { %v1876_v2 = vpop.eup %1875  ;;  %1895 = vpow2.f32 %v1202_v11  ;;  %v1522_v34 = vmul.f32 %v1874_v33, %v4118_v43  ;;  %v3083_v13 = vmul.f32 %v651_v27, %v4159_v32  ;;  %v3086_v53 = vmul.f32 %v651_v27, %v4160_v35  ;;  %v4167_v33 = vld [vmem:[#allocation30_spill] sm:$0xff] }
  0xe1   :  { %v1878_v8 = vpop.eup %1877  ;;  %1897 = vpow2.f32 %v1204_v21  ;;  %v1523_v38 = vmul.f32 %v1876_v2, %v4158_v55  ;;  %1661 = vst [vmem:[#allocation2 + $0x140] sm:$0xff] %v1521_v44  ;;  %v3090_v50 = vmul.f32 %v651_v27, %v4162_v30  ;;  %v3093_v46 = vmul.f32 %v651_v27, %v4163_v6  ;;  %v4166_v21 = vld [vmem:[#allocation93_spill] sm:$0xff]  ;;  %v4168_v2 = vld [vmem:[#allocation94_spill] sm:$0xff] }
  0xe2   :  { %v1880_v36 = vpop.eup %1879  ;;  %1899 = vpow2.f32 %v1206_v12  ;;  %v1524_v48 = vmul.f32 %v1878_v8, %v4161_v24  ;;  %1662 = vst [vmem:[#allocation2 + $0x148] sm:$0xff] %v1522_v34  ;;  %v3097_v11 = vmul.f32 %v651_v27, %v4165_v37  ;;  %v3100_v58 = vmul.f32 %v651_v27, %v4166_v21  ;;  %v4169_v8 = vld [vmem:[#allocation95_spill] sm:$0xff] }
  0xe3   :  { %v1882_v49 = vpop.eup %1881  ;;  %1901 = vpow2.f32 %v1208_v47  ;;  %v1525_v42 = vmul.f32 %v1880_v36, %v4164_v52  ;;  %1663 = vst [vmem:[#allocation2 + $0x150] sm:$0xff] %v1523_v38  ;;  %v3104_v34 = vmul.f32 %v651_v27, %v4168_v2  ;;  %v3107_v17 = vmul.f32 %v651_v27, %v4169_v8  ;;  %v4170_v38 = vld [vmem:[#allocation31_spill] sm:$0xff]  ;;  %v4172_v52 = vld [vmem:[#allocation97_spill] sm:$0xff] }
  0xe4   :  { %v1884_v12 = vpop.eup %1883  ;;  %1903 = vpow2.f32 %v1210_v41  ;;  %v1526_v44 = vmul.f32 %v1882_v49, %v4167_v33  ;;  %1664 = vst [vmem:[#allocation2 + $0x158] sm:$0xff] %v1524_v48  ;;  %v3111_v15 = vmul.f32 %v651_v27, %v4171_v29  ;;  %v3114_v24 = vmul.f32 %v651_v27, %v4172_v52  ;;  %v4173_v49 = vld [vmem:[#allocation98_spill] sm:$0xff] }
  0xe5   :  { %v1886_v47 = vpop.eup %1885  ;;  %1905 = vpow2.f32 %v1212_v51  ;;  %v1527_v36 = vmul.f32 %v1884_v12, %v4170_v38  ;;  %1665 = vst [vmem:[#allocation2 + $0x160] sm:$0xff] %v1525_v42  ;;  %v3118_v33 = vmul.f32 %v651_v27, %v4173_v49  ;;  %v838_v55 = vsub.f32 0.0, %v3053_v5  ;;  %v4174_v12 = vld [vmem:[#allocation33_spill] sm:$0xff] }
  0xe6   :  { %v1888_v41 = vpop.eup %1887  ;;  %1907 = vpow2.f32 %v1214_v56  ;;  %v1528_v48 = vmul.f32 %v1886_v47, %v4136_v25  ;;  %1666 = vst [vmem:[#allocation2 + $0x168] sm:$0xff] %v1526_v44  ;;  %v839_v38 = vsub.f32 0.0, %v3056_v61  ;;  %v840_v43 = vsub.f32 0.0, %v3059_v10  ;;  %v4176_v25 = vld [vmem:[#allocation35_spill] sm:$0xff] }
  0xe7   :  { %v1890_v51 = vpop.eup %1889  ;;  %1909 = vpow2.f32 %v1216_v0  ;;  %v1529_v42 = vmul.f32 %v1888_v41, %v4174_v12  ;;  %1667 = vst [vmem:[#allocation2 + $0x170] sm:$0xff] %v1527_v36  ;;  %v841_v44 = vsub.f32 0.0, %v3062_v62  ;;  %v842_v27 = vsub.f32 0.0, %v3065_v14  ;;  %v4177_v12 = vld [vmem:[#allocation36_spill] sm:$0xff] }
  0xe8   :  { %v1892_v39 = vpop.eup %1891  ;;  %v1530_v56 = vmul.f32 %v1890_v51, %v4175_v3  ;;  %1668 = vst [vmem:[#allocation2 + $0x178] sm:$0xff] %v1528_v48  ;;  %v843_v47 = vsub.f32 0.0, %v3069_v40  ;;  %v844_v36 = vsub.f32 0.0, %v3072_v63  ;;  %v845_v61 = vsub.f32 0.0, %v3076_v31  ;;  %v4178_v3 = vld [vmem:[#allocation37_spill] sm:$0xff] }
  0xe9   :  { %v1894_v5 = vpop.eup %1893  ;;  %v1531_v0 = vmul.f32 %v1892_v39, %v4176_v25  ;;  %1669 = vst [vmem:[#allocation2 + $0x180] sm:$0xff] %v1529_v42  ;;  %v846_v10 = vsub.f32 0.0, %v3079_v1  ;;  %v847_v62 = vsub.f32 0.0, %v3083_v13  ;;  %v848_v14 = vsub.f32 0.0, %v3086_v53 }
  0xea   :  { %v1896_v41 = vpop.eup %1895  ;;  %v1532_v51 = vmul.f32 %v1894_v5, %v4177_v12  ;;  %1670 = vst [vmem:[#allocation2 + $0x188] sm:$0xff] %v1530_v56  ;;  %v849_v40 = vsub.f32 0.0, %v3090_v50  ;;  %v850_v63 = vsub.f32 0.0, %v3093_v46  ;;  %v851_v31 = vsub.f32 0.0, %v3097_v11 }
  0xeb   :  { %v1898_v48 = vpop.eup %1897  ;;  %v1533_v39 = vmul.f32 %v1896_v41, %v4178_v3  ;;  %1671 = vst [vmem:[#allocation2 + $0x190] sm:$0xff] %v1531_v0  ;;  %v852_v1 = vsub.f32 0.0, %v3100_v58  ;;  %v853_v13 = vsub.f32 0.0, %v3104_v34  ;;  %v854_v53 = vsub.f32 0.0, %v3107_v17 }
  0xec   :  { %v1900_v42 = vpop.eup %1899  ;;  %v1534_v5 = vmul.f32 %v1898_v48, %v4142_v22  ;;  %1672 = vst [vmem:[#allocation2 + $0x198] sm:$0xff] %v1532_v51  ;;  %v978_v50 = vmul.f32 %v838_v55, %v4149_v59  ;;  %v979_v46 = vmul.f32 %v839_v38, %v4150_v28  ;;  %v980_v11 = vmul.f32 %v840_v43, %v4151_v9 }
  0xed   :  { %v1902_v56 = vpop.eup %1901  ;;  %v1535_v41 = vmul.f32 %v1900_v42, %v4143_v26  ;;  %1673 = vst [vmem:[#allocation2 + $0x1a0] sm:$0xff] %v1533_v39  ;;  %v981_v58 = vmul.f32 %v841_v44, %v4152_v18  ;;  %v855_v34 = vsub.f32 0.0, %v3111_v15  ;;  %v856_v17 = vsub.f32 0.0, %v3114_v24 }
  0xee   :  { %v1904_v0 = vpop.eup %1903  ;;  %v1536_v48 = vmul.f32 %v1902_v56, %v4144_v57  ;;  %1674 = vst [vmem:[#allocation2 + $0x1a8] sm:$0xff] %v1534_v5  ;;  %v982_v59 = vmul.f32 %v842_v27, %v4153_v7  ;;  %v857_v28 = vsub.f32 0.0, %v3118_v33  ;;  %v983_v43 = vmul.f32 %v843_v47, %v4154_v19 }
  0xef   :  { %v1906_v55 = vpop.eup %1905  ;;  %v1537_v51 = vmul.f32 %v1904_v0, %v2912_v60  ;;  %1675 = vst [vmem:[#allocation2 + $0x1b0] sm:$0xff] %v1535_v41  ;;  %v984_v9 = vmul.f32 %v844_v36, %v4155_v16  ;;  %v985_v15 = vmul.f32 %v845_v61, %v4156_v23  ;;  %v986_v24 = vmul.f32 %v846_v10, %v4157_v4 }
  0xf0   :  { %v1908_v18 = vpop.eup %1907  ;;  %v1538_v38 = vmul.f32 %v1906_v55, %v2916_v20  ;;  %1676 = vst [vmem:[#allocation2 + $0x1b8] sm:$0xff] %v1536_v48  ;;  %v1138_v44 = vmul.f32 1.442695, %v978_v50  ;;  %v1140_v39 = vmul.f32 1.442695, %v979_v46  ;;  %v987_v16 = vmul.f32 %v847_v62, %v4159_v32  ;;  %v4183_v48 = vld [vmem:[#allocation99_spill] sm:$0xff] }
  0xf1   :  { %v1910_v7 = vpop.eup %1909  ;;  %v1539_v27 = vmul.f32 %v1908_v18, %v2920_v45  ;;  %1677 = vst [vmem:[#allocation2 + $0x1c0] sm:$0xff] %v1537_v51  ;;  %v1142_v42 = vmul.f32 1.442695, %v980_v11  ;;  %v1144_v33 = vmul.f32 1.442695, %v981_v58  ;;  %v988_v23 = vmul.f32 %v848_v14, %v4160_v35  ;;  %v4185_v55 = vld [vmem:[#allocation101_spill] sm:$0xff] }
  0xf2   :  { %v1540_v19 = vmul.f32 %v1910_v7, %v2924_v54  ;;  %1678 = vst [vmem:[#allocation2 + $0x1c8] sm:$0xff] %v1538_v38  ;;  %1911 = vpow2.f32 %v1138_v44  ;;  %v1146_v47 = vmul.f32 1.442695, %v982_v59  ;;  %v989_v4 = vmul.f32 %v849_v40, %v4162_v30  ;;  %v4179_v40 = vld [vmem:[#allocation89_spill] sm:$0xff]  ;;  %v4187_v18 = vld [vmem:[#allocation102_spill] sm:$0xff] }
  0xf3   :  { %1679 = vst [vmem:[#allocation2 + $0x1d0] sm:$0xff] %v1539_v27  ;;  %1913 = vpow2.f32 %v1140_v39  ;;  %v1148_v36 = vmul.f32 1.442695, %v983_v43  ;;  %v990_v61 = vmul.f32 %v850_v63, %v4163_v6  ;;  %v991_v10 = vmul.f32 %v851_v31, %v4165_v37  ;;  %v4180_v63 = vld [vmem:[#allocation23_spill] sm:$0xff]  ;;  %v4186_v43 = vld [vmem:[#allocation25_spill] sm:$0xff]  ;;  %v4189_v7 = vld [vmem:[#allocation26_spill] sm:$0xff] }
  0xf4   :  { %1680 = vst [vmem:[#allocation2 + $0x1d8] sm:$0xff] %v1540_v19  ;;  %1915 = vpow2.f32 %v1142_v42  ;;  %v1150_v5 = vmul.f32 1.442695, %v984_v9  ;;  %v992_v50 = vmul.f32 %v852_v1, %v4166_v21  ;;  %v993_v32 = vmul.f32 %v853_v13, %v4168_v2  ;;  %v4182_v21 = vld [vmem:[#allocation24_spill] sm:$0xff] }
  0xf5   :  { %1917 = vpow2.f32 %v1144_v33  ;;  %v1152_v62 = vmul.f32 1.442695, %v985_v15  ;;  %v994_v56 = vmul.f32 %v854_v53, %v4169_v8  ;;  %v995_v35 = vmul.f32 %v855_v34, %v4171_v29  ;;  %v3180_v53 = vpop.permute.xlu1 %665  ;;  %v4188_v15 = vld [vmem:[#allocation103_spill] sm:$0xff]  ;;  %v4190_v39 = vld [vmem:[#allocation104_spill] sm:$0xff]  ;;  %v4191_v33 = vld [vmem:[#allocation105_spill] sm:$0xff] }
  0xf6   :  { %1919 = vpow2.f32 %v1146_v47  ;;  %v1154_v30 = vmul.f32 1.442695, %v986_v24  ;;  %v996_v14 = vmul.f32 %v856_v17, %v4172_v52  ;;  %v997_v6 = vmul.f32 %v857_v28, %v4173_v49  ;;  %v4184_v17 = vld [vmem:[#allocation100_spill] sm:$0xff]  ;;  %v4192_v47 = vld [vmem:[#allocation27_spill] sm:$0xff] }
  0xf7   :  { %1921 = vpow2.f32 %v1148_v36  ;;  %v1156_v37 = vmul.f32 1.442695, %v987_v16  ;;  %v3174_v31 = vsub.f32 %v4180_v63, %v4179_v40  ;;  %v3178_v2 = vsub.f32 %v4182_v21, %v4179_v40  ;;  %v4199_v40 = vld [vmem:[#allocation110_spill] sm:$0xff] }
  0xf8   :  { %1923 = vpow2.f32 %v1150_v5  ;;  %v1158_v8 = vmul.f32 1.442695, %v988_v23  ;;  %v1160_v29 = vmul.f32 1.442695, %v989_v4  ;;  %v1162_v1 = vmul.f32 1.442695, %v990_v61 }
  0xf9   :  { %4181 = vst [vmem:[#allocation43_spill] sm:$0xff] %v3174_v31  ;;  %1925 = vpow2.f32 %v1152_v62  ;;  %v1164_v13 = vmul.f32 1.442695, %v991_v10  ;;  %v1166_v52 = vmul.f32 1.442695, %v992_v50  ;;  %v3184_v34 = vmul.f32 %v3180_v53, %v4183_v48  ;;  %v4193_v4 = vld [vmem:[#allocation106_spill] sm:$0xff] }
  0xfa   :  { %1927 = vpow2.f32 %v1154_v30  ;;  %v1168_v49 = vmul.f32 1.442695, %v993_v32  ;;  %v1170_v41 = vmul.f32 1.442695, %v994_v56  ;;  %v1172_v46 = vmul.f32 1.442695, %v995_v35 }
  0xfb   :  { %1929 = vpow2.f32 %v1156_v37  ;;  %v1174_v11 = vmul.f32 1.442695, %v996_v14  ;;  %v1176_v58 = vmul.f32 1.442695, %v997_v6  ;;  %v3188_v59 = vmul.f32 %v3180_v53, %v4184_v17  ;;  %v4194_v61 = vld [vmem:[#allocation107_spill] sm:$0xff]  ;;  %v4195_v50 = vld [vmem:[#allocation28_spill] sm:$0xff] }
  0xfc   :  { %v1912_v0 = vpop.eup %1911  ;;  %1931 = vpow2.f32 %v1158_v8  ;;  %v3192_v51 = vmul.f32 %v3180_v53, %v4185_v55  ;;  %v3197_v38 = vmul.f32 %v3180_v53, %v4187_v18  ;;  %v3201_v24 = vmul.f32 %v3180_v53, %v4188_v15  ;;  %v4196_v62 = vld [vmem:[#allocation108_spill] sm:$0xff]  ;;  %v4197_v35 = vld [vmem:[#allocation109_spill] sm:$0xff] }
  0xfd   :  { %v1914_v28 = vpop.eup %1913  ;;  %1933 = vpow2.f32 %v1160_v29  ;;  %v1501_v9 = vmul.f32 %v1912_v0, %v4186_v43  ;;  %v3206_v42 = vmul.f32 %v3180_v53, %v4190_v39  ;;  %v3210_v19 = vmul.f32 %v3180_v53, %v4191_v33  ;;  %v4198_v6 = vld [vmem:[#allocation29_spill] sm:$0xff]  ;;  %v4200_v29 = vld [vmem:[#allocation111_spill] sm:$0xff] }
  0xfe   :  { %v1916_v44 = vpop.eup %1915  ;;  %1935 = vpow2.f32 %v1162_v1  ;;  %v1502_v27 = vmul.f32 %v1914_v28, %v4189_v7  ;;  %v3215_v36 = vmul.f32 %v3180_v53, %v4193_v4  ;;  %v3219_v10 = vmul.f32 %v3180_v53, %v4194_v61  ;;  %v4202_v28 = vld [vmem:[#allocation112_spill] sm:$0xff] }
  0xff   :  { %v1918_v16 = vpop.eup %1917  ;;  %1937 = vpow2.f32 %v1164_v13  ;;  %v1503_v23 = vmul.f32 %v1916_v44, %v4192_v47  ;;  %1641 = vst [vmem:[#allocation2 + $0xa0] sm:$0xff] %v1501_v9  ;;  %v3224_v56 = vmul.f32 %v3180_v53, %v4196_v62  ;;  %v3228_v30 = vmul.f32 %v3180_v53, %v4197_v35  ;;  %v4208_v47 = vld [vmem:[#allocation42_spill] sm:$0xff] }
 0x100   :  { %v1920_v5 = vpop.eup %1919  ;;  %1939 = vpow2.f32 %v1166_v52  ;;  %v1504_v32 = vmul.f32 %v1918_v16, %v4195_v50  ;;  %1642 = vst [vmem:[#allocation2 + $0xa8] sm:$0xff] %v1502_v27  ;;  %v3233_v8 = vmul.f32 %v3180_v53, %v4199_v40  ;;  %v3237_v1 = vmul.f32 %v3180_v53, %v4200_v29  ;;  %v4201_v52 = vld [vmem:[#allocation30_spill] sm:$0xff]  ;;  %v4204_v16 = vld [vmem:[#allocation31_spill] sm:$0xff] }
 0x101   :  { %v1922_v14 = vpop.eup %1921  ;;  %1941 = vpow2.f32 %v1168_v49  ;;  %v1505_v37 = vmul.f32 %v1920_v5, %v4198_v6  ;;  %1643 = vst [vmem:[#allocation2 + $0xb0] sm:$0xff] %v1503_v23  ;;  %v3242_v9 = vmul.f32 %v3180_v53, %v4202_v28  ;;  %v4203_v49 = vld [vmem:[#allocation113_spill] sm:$0xff]  ;;  %v4205_v5 = vld [vmem:[#allocation114_spill] sm:$0xff]  ;;  %v3260_v7 = vmul.f32 %v3180_v53, %v4208_v47 }
 0x102   :  { %v1924_v13 = vpop.eup %1923  ;;  %1943 = vpow2.f32 %v1170_v41  ;;  %v1506_v0 = vmul.f32 %v1922_v14, %v4201_v52  ;;  %1644 = vst [vmem:[#allocation2 + $0xb8] sm:$0xff] %v1504_v32  ;;  %v3246_v44 = vmul.f32 %v3180_v53, %v4203_v49  ;;  %v3251_v6 = vmul.f32 %v3180_v53, %v4205_v5  ;;  %v4206_v41 = vld [vmem:[#allocation115_spill] sm:$0xff]  ;;  %v4207_v52 = vld [vmem:[#allocation32_spill] sm:$0xff] }
 0x103   :  { %v1926_v27 = vpop.eup %1925  ;;  %1945 = vpow2.f32 %v1172_v46  ;;  %v1507_v23 = vmul.f32 %v1924_v13, %v4204_v16  ;;  %1645 = vst [vmem:[#allocation2 + $0xc0] sm:$0xff] %v1505_v37  ;;  %v3255_v32 = vmul.f32 %v3180_v53, %v4206_v41  ;;  %v3264_v46 = vmul.f32 %v3180_v53, %v3174_v31  ;;  %v4209_v13 = vld [vmem:[#allocation33_spill] sm:$0xff] }
 0x104   :  { %v1928_v14 = vpop.eup %1927  ;;  %1947 = vpow2.f32 %v1174_v11  ;;  %v1508_v50 = vmul.f32 %v1926_v27, %v4207_v52  ;;  %1646 = vst [vmem:[#allocation2 + $0xc8] sm:$0xff] %v1506_v0  ;;  %v3269_v43 = vmul.f32 %v3180_v53, %v3178_v2  ;;  %v898_v11 = vsub.f32 0.0, %v3184_v34  ;;  %v4210_v27 = vld [vmem:[#allocation34_spill] sm:$0xff] }
 0x105   :  { %v1930_v37 = vpop.eup %1929  ;;  %1949 = vpow2.f32 %v1176_v58  ;;  %v1509_v16 = vmul.f32 %v1928_v14, %v4209_v13  ;;  %1647 = vst [vmem:[#allocation2 + $0xd0] sm:$0xff] %v1507_v23  ;;  %v899_v21 = vsub.f32 0.0, %v3188_v59  ;;  %v900_v63 = vsub.f32 0.0, %v3192_v51 }
 0x106   :  { %v1932_v0 = vpop.eup %1931  ;;  %v1510_v52 = vmul.f32 %v1930_v37, %v4210_v27  ;;  %1648 = vst [vmem:[#allocation2 + $0xd8] sm:$0xff] %v1508_v50  ;;  %v901_v31 = vsub.f32 0.0, %v3197_v38  ;;  %v902_v23 = vsub.f32 0.0, %v3201_v24  ;;  %v903_v53 = vsub.f32 0.0, %v3206_v42 }
 0x107   :  { %v1934_v58 = vpop.eup %1933  ;;  %v1511_v14 = vmul.f32 %v1932_v0, %v4176_v25  ;;  %1649 = vst [vmem:[#allocation2 + $0xe0] sm:$0xff] %v1509_v16  ;;  %v904_v34 = vsub.f32 0.0, %v3210_v19  ;;  %v905_v59 = vsub.f32 0.0, %v3215_v36  ;;  %v906_v51 = vsub.f32 0.0, %v3219_v10 }
 0x108   :  { %v1936_v13 = vpop.eup %1935  ;;  %v1512_v37 = vmul.f32 %v1934_v58, %v4177_v12  ;;  %1650 = vst [vmem:[#allocation2 + $0xe8] sm:$0xff] %v1510_v52  ;;  %v907_v38 = vsub.f32 0.0, %v3224_v56  ;;  %v908_v24 = vsub.f32 0.0, %v3228_v30  ;;  %v909_v42 = vsub.f32 0.0, %v3233_v8 }
 0x109   :  { %v1938_v50 = vpop.eup %1937  ;;  %v1513_v0 = vmul.f32 %v1936_v13, %v4178_v3  ;;  %1651 = vst [vmem:[#allocation2 + $0xf0] sm:$0xff] %v1511_v14  ;;  %v910_v19 = vsub.f32 0.0, %v3237_v1  ;;  %v911_v36 = vsub.f32 0.0, %v3242_v9  ;;  %v912_v10 = vsub.f32 0.0, %v3246_v44 }
 0x10a   :  { %v1940_v16 = vpop.eup %1939  ;;  %v1514_v58 = vmul.f32 %v1938_v50, %v4142_v22  ;;  %1652 = vst [vmem:[#allocation2 + $0xf8] sm:$0xff] %v1512_v37  ;;  %v1038_v56 = vmul.f32 %v898_v11, %v4183_v48  ;;  %v1039_v30 = vmul.f32 %v899_v21, %v4184_v17  ;;  %v1040_v8 = vmul.f32 %v900_v63, %v4185_v55 }
 0x10b   :  { %v1942_v52 = vpop.eup %1941  ;;  %v1515_v13 = vmul.f32 %v1940_v16, %v4143_v26  ;;  %1653 = vst [vmem:[#allocation2 + $0x100] sm:$0xff] %v1513_v0  ;;  %v1041_v1 = vmul.f32 %v901_v31, %v4187_v18  ;;  %v913_v9 = vsub.f32 0.0, %v3251_v6  ;;  %v914_v44 = vsub.f32 0.0, %v3255_v32 }
 0x10c   :  { %v1944_v14 = vpop.eup %1943  ;;  %v1516_v50 = vmul.f32 %v1942_v52, %v4144_v57  ;;  %1654 = vst [vmem:[#allocation2 + $0x108] sm:$0xff] %v1514_v58  ;;  %v1042_v48 = vmul.f32 %v902_v23, %v4188_v15  ;;  %v915_v21 = vsub.f32 0.0, %v3260_v7  ;;  %v916_v63 = vsub.f32 0.0, %v3264_v46 }
 0x10d   :  { %v1946_v11 = vpop.eup %1945  ;;  %v1517_v37 = vmul.f32 %v1944_v14, %v2912_v60  ;;  %1655 = vst [vmem:[#allocation2 + $0x110] sm:$0xff] %v1515_v13  ;;  %v1043_v31 = vmul.f32 %v903_v53, %v4190_v39  ;;  %v1044_v18 = vmul.f32 %v904_v34, %v4191_v33  ;;  %v1045_v6 = vmul.f32 %v905_v59, %v4193_v4 }
 0x10e   :  { %v1948_v17 = vpop.eup %1947  ;;  %v1518_v55 = vmul.f32 %v1946_v11, %v2916_v20  ;;  %1656 = vst [vmem:[#allocation2 + $0x118] sm:$0xff] %v1516_v50  ;;  %v1258_v32 = vmul.f32 1.442695, %v1038_v56  ;;  %v1260_v0 = vmul.f32 1.442695, %v1039_v30  ;;  %v1046_v39 = vmul.f32 %v906_v51, %v4194_v61 }
 0x10f   :  { %v1950_v15 = vpop.eup %1949  ;;  %v1519_v23 = vmul.f32 %v1948_v17, %v2920_v45  ;;  %1657 = vst [vmem:[#allocation2 + $0x120] sm:$0xff] %v1517_v37  ;;  %v1262_v16 = vmul.f32 1.442695, %v1040_v8  ;;  %v1264_v7 = vmul.f32 1.442695, %v1041_v1  ;;  %v917_v33 = vsub.f32 0.0, %v3269_v43 }
 0x110   :  { %v1520_v46 = vmul.f32 %v1950_v15, %v2924_v54  ;;  %1658 = vst [vmem:[#allocation2 + $0x128] sm:$0xff] %v1518_v55  ;;  %1951 = vpow2.f32 %v1258_v32  ;;  %v1266_v53 = vmul.f32 1.442695, %v1042_v48  ;;  %v1047_v4 = vmul.f32 %v907_v38, %v4196_v62  ;;  %v4217_v17 = vld [vmem:[#allocation60_spill] sm:$0xff]  ;;  %v4219_v15 = vld [vmem:[#allocation26_spill] sm:$0xff] }
 0x111   :  { %1659 = vst [vmem:[#allocation2 + $0x130] sm:$0xff] %v1519_v23  ;;  %1953 = vpow2.f32 %v1260_v0  ;;  %v1268_v34 = vmul.f32 1.442695, %v1043_v31  ;;  %v1048_v59 = vmul.f32 %v908_v24, %v4197_v35  ;;  %v1049_v58 = vmul.f32 %v909_v42, %v4199_v40  ;;  %v4211_v24 = vld [vmem:[#allocation43_spill] sm:$0xff]  ;;  %v4220_v0 = vld [vmem:[#allocation62_spill] sm:$0xff] }
 0x112   :  { %1660 = vst [vmem:[#allocation2 + $0x138] sm:$0xff] %v1520_v46  ;;  %1955 = vpow2.f32 %v1262_v16  ;;  %v1270_v56 = vmul.f32 1.442695, %v1044_v18  ;;  %v1050_v52 = vmul.f32 %v910_v19, %v4200_v29  ;;  %v1051_v61 = vmul.f32 %v911_v36, %v4202_v28  ;;  %v4212_v19 = vld [vmem:[#allocation59_spill] sm:$0xff]  ;;  %v4213_v36 = vld [vmem:[#allocation22_spill] sm:$0xff]  ;;  %v4218_v18 = vld [vmem:[#allocation61_spill] sm:$0xff] }
 0x113   :  { %1957 = vpow2.f32 %v1264_v7  ;;  %v1272_v51 = vmul.f32 1.442695, %v1045_v6  ;;  %v1052_v13 = vmul.f32 %v912_v10, %v4203_v49  ;;  %v1053_v43 = vmul.f32 %v913_v9, %v4205_v5  ;;  %v4214_v49 = vld [vmem:[#allocation23_spill] sm:$0xff] }
 0x114   :  { %1959 = vpow2.f32 %v1266_v53  ;;  %v1274_v62 = vmul.f32 1.442695, %v1046_v39  ;;  %v1054_v38 = vmul.f32 %v914_v44, %v4206_v41  ;;  %v1055_v35 = vmul.f32 %v915_v21, %v4208_v47  ;;  %v4215_v47 = vld [vmem:[#allocation24_spill] sm:$0xff]  ;;  %v4221_v7 = vld [vmem:[#allocation63_spill] sm:$0xff] }
 0x115   :  { %1961 = vpow2.f32 %v1268_v34  ;;  %v1276_v40 = vmul.f32 1.442695, %v1047_v4  ;;  %v1056_v42 = vmul.f32 %v916_v63, %v4211_v24  ;;  %v1057_v29 = vmul.f32 %v917_v33, %v3178_v2  ;;  %v3334_v2 = vpop.permute.xlu0 %660  ;;  %v4216_v63 = vld [vmem:[#allocation25_spill] sm:$0xff]  ;;  %v4222_v53 = vld [vmem:[#allocation27_spill] sm:$0xff]  ;;  %v4223_v4 = vld [vmem:[#allocation64_spill] sm:$0xff] }
 0x116   :  { %1963 = vpow2.f32 %v1270_v56  ;;  %v1278_v28 = vmul.f32 1.442695, %v1048_v59  ;;  %v3324_v30 = vsub.f32 %v4213_v36, %v4212_v19  ;;  %v3328_v5 = vsub.f32 %v4214_v49, %v4212_v19  ;;  %v4224_v59 = vld [vmem:[#allocation65_spill] sm:$0xff]  ;;  %v4229_v24 = vld [vmem:[#allocation68_spill] sm:$0xff] }
 0x117   :  { %1965 = vpow2.f32 %v1272_v51  ;;  %v1280_v41 = vmul.f32 1.442695, %v1049_v58  ;;  %v3332_v10 = vsub.f32 %v4215_v47, %v4212_v19  ;;  %v1282_v8 = vmul.f32 1.442695, %v1050_v52  ;;  %v4225_v52 = vld [vmem:[#allocation28_spill] sm:$0xff]  ;;  %v4226_v51 = vld [vmem:[#allocation66_spill] sm:$0xff] }
 0x118   :  { %1967 = vpow2.f32 %v1274_v62  ;;  %v1284_v1 = vmul.f32 1.442695, %v1051_v61  ;;  %v1286_v14 = vmul.f32 1.442695, %v1052_v13  ;;  %v1288_v50 = vmul.f32 1.442695, %v1053_v43 }
 0x119   :  { %1969 = vpow2.f32 %v1276_v40  ;;  %v1290_v9 = vmul.f32 1.442695, %v1054_v38  ;;  %v1292_v48 = vmul.f32 1.442695, %v1055_v35  ;;  %v1294_v11 = vmul.f32 1.442695, %v1056_v42 }
 0x11a   :  { %v1952_v44 = vpop.eup %1951  ;;  %1971 = vpow2.f32 %v1278_v28  ;;  %v1296_v37 = vmul.f32 1.442695, %v1057_v29  ;;  %v3339_v55 = vmul.f32 %v3334_v2, %v4217_v17  ;;  %v3343_v6 = vmul.f32 %v3334_v2, %v4218_v18  ;;  %v4227_v43 = vld [vmem:[#allocation67_spill] sm:$0xff]  ;;  %v4228_v35 = vld [vmem:[#allocation29_spill] sm:$0xff]  ;;  %v4238_v47 = vld [vmem:[#allocation74_spill] sm:$0xff] }
 0x11b   :  { %v1954_v21 = vpop.eup %1953  ;;  %1973 = vpow2.f32 %v1280_v41  ;;  %v1561_v31 = vmul.f32 %v1952_v44, %v4216_v63  ;;  %v3348_v16 = vmul.f32 %v3334_v2, %v4220_v0  ;;  %v3352_v46 = vmul.f32 %v3334_v2, %v4221_v7  ;;  %v4230_v29 = vld [vmem:[#allocation69_spill] sm:$0xff]  ;;  %v4231_v41 = vld [vmem:[#allocation30_spill] sm:$0xff] }
 0x11c   :  { %v1956_v32 = vpop.eup %1955  ;;  %1975 = vpow2.f32 %v1282_v8  ;;  %v1562_v23 = vmul.f32 %v1954_v21, %v4219_v15  ;;  %v3357_v34 = vmul.f32 %v3334_v2, %v4223_v4  ;;  %v3361_v58 = vmul.f32 %v3334_v2, %v4224_v59  ;;  %v4240_v36 = vld [vmem:[#allocation33_spill] sm:$0xff] }
 0x11d   :  { %v1958_v39 = vpop.eup %1957  ;;  %1977 = vpow2.f32 %v1284_v1  ;;  %v1563_v33 = vmul.f32 %v1956_v32, %v4222_v53  ;;  %1701 = vst [vmem:[#allocation2 + $0x280] sm:$0xff] %v1561_v31  ;;  %v3366_v13 = vmul.f32 %v3334_v2, %v4226_v51  ;;  %v3370_v62 = vmul.f32 %v3334_v2, %v4227_v43  ;;  %v4232_v1 = vld [vmem:[#allocation70_spill] sm:$0xff]  ;;  %v4234_v31 = vld [vmem:[#allocation31_spill] sm:$0xff] }
 0x11e   :  { %v1960_v56 = vpop.eup %1959  ;;  %1979 = vpow2.f32 %v1286_v14  ;;  %v1564_v61 = vmul.f32 %v1958_v39, %v4225_v52  ;;  %1702 = vst [vmem:[#allocation2 + $0x288] sm:$0xff] %v1562_v23  ;;  %v3375_v42 = vmul.f32 %v3334_v2, %v4229_v24  ;;  %v3379_v28 = vmul.f32 %v3334_v2, %v4230_v29  ;;  %v4235_v23 = vld [vmem:[#allocation72_spill] sm:$0xff] }
 0x11f   :  { %v1962_v38 = vpop.eup %1961  ;;  %1981 = vpow2.f32 %v1288_v50  ;;  %v1565_v40 = vmul.f32 %v1960_v56, %v4228_v35  ;;  %1703 = vst [vmem:[#allocation2 + $0x290] sm:$0xff] %v1563_v33  ;;  %v3384_v14 = vmul.f32 %v3334_v2, %v4232_v1  ;;  %v4233_v50 = vld [vmem:[#allocation71_spill] sm:$0xff]  ;;  %v3393_v39 = vmul.f32 %v3334_v2, %v4235_v23 }
 0x120   :  { %v1964_v19 = vpop.eup %1963  ;;  %1983 = vpow2.f32 %v1290_v9  ;;  %v1566_v8 = vmul.f32 %v1962_v38, %v4231_v41  ;;  %1704 = vst [vmem:[#allocation2 + $0x298] sm:$0xff] %v1564_v61  ;;  %v3388_v44 = vmul.f32 %v3334_v2, %v4233_v50  ;;  %v4236_v9 = vld [vmem:[#allocation73_spill] sm:$0xff]  ;;  %v4237_v61 = vld [vmem:[#allocation32_spill] sm:$0xff]  ;;  %v3402_v49 = vmul.f32 %v3334_v2, %v4238_v47 }
 0x121   :  { %v1966_v21 = vpop.eup %1965  ;;  %1985 = vpow2.f32 %v1292_v48  ;;  %v1567_v32 = vmul.f32 %v1964_v19, %v4234_v31  ;;  %1705 = vst [vmem:[#allocation2 + $0x2a0] sm:$0xff] %v1565_v40  ;;  %v3397_v33 = vmul.f32 %v3334_v2, %v4236_v9  ;;  %v4239_v48 = vld [vmem:[#allocation75_spill] sm:$0xff]  ;;  %v4241_v41 = vld [vmem:[#allocation76_spill] sm:$0xff]  ;;  %v879_v52 = vsub.f32 0.0, %v3343_v6 }
 0x122   :  { %v1968_v56 = vpop.eup %1967  ;;  %1987 = vpow2.f32 %v1294_v11  ;;  %v1568_v38 = vmul.f32 %v1966_v21, %v4237_v61  ;;  %1706 = vst [vmem:[#allocation2 + $0x2a8] sm:$0xff] %v1566_v8  ;;  %v3406_v40 = vmul.f32 %v3334_v2, %v4239_v48  ;;  %v3411_v35 = vmul.f32 %v3334_v2, %v4241_v41 }
 0x123   :  { %v1970_v19 = vpop.eup %1969  ;;  %1989 = vpow2.f32 %v1296_v37  ;;  %v1569_v31 = vmul.f32 %v1968_v56, %v4240_v36  ;;  %1707 = vst [vmem:[#allocation2 + $0x2b0] sm:$0xff] %v1567_v32  ;;  %v3415_v11 = vmul.f32 %v3334_v2, %v3324_v30  ;;  %v3420_v61 = vmul.f32 %v3334_v2, %v3328_v5 }
 0x124   :  { %v1972_v8 = vpop.eup %1971  ;;  %v1570_v21 = vmul.f32 %v1970_v19, %v4210_v27  ;;  %1708 = vst [vmem:[#allocation2 + $0x2b8] sm:$0xff] %v1568_v38  ;;  %v3424_v37 = vmul.f32 %v3334_v2, %v3332_v10  ;;  %v878_v32 = vsub.f32 0.0, %v3339_v55  ;;  %v880_v53 = vsub.f32 0.0, %v3348_v16 }
 0x125   :  { %v1974_v56 = vpop.eup %1973  ;;  %v1571_v36 = vmul.f32 %v1972_v8, %v4176_v25  ;;  %1709 = vst [vmem:[#allocation2 + $0x2c0] sm:$0xff] %v1569_v31  ;;  %v881_v38 = vsub.f32 0.0, %v3352_v46  ;;  %v882_v15 = vsub.f32 0.0, %v3357_v34  ;;  %v883_v2 = vsub.f32 0.0, %v3361_v58 }
 0x126   :  { %v1976_v19 = vpop.eup %1975  ;;  %v1572_v27 = vmul.f32 %v1974_v56, %v4177_v12  ;;  %1710 = vst [vmem:[#allocation2 + $0x2c8] sm:$0xff] %v1570_v21  ;;  %v884_v55 = vsub.f32 0.0, %v3366_v13  ;;  %v885_v6 = vsub.f32 0.0, %v3370_v62  ;;  %v886_v16 = vsub.f32 0.0, %v3375_v42 }
 0x127   :  { %v1978_v63 = vpop.eup %1977  ;;  %v1573_v8 = vmul.f32 %v1976_v19, %v4178_v3  ;;  %1711 = vst [vmem:[#allocation2 + $0x2d0] sm:$0xff] %v1571_v36  ;;  %v887_v46 = vsub.f32 0.0, %v3379_v28  ;;  %v888_v34 = vsub.f32 0.0, %v3384_v14  ;;  %v889_v58 = vsub.f32 0.0, %v3388_v44 }
 0x128   :  { %v1980_v31 = vpop.eup %1979  ;;  %v1574_v56 = vmul.f32 %v1978_v63, %v4142_v22  ;;  %1712 = vst [vmem:[#allocation2 + $0x2d8] sm:$0xff] %v1572_v27  ;;  %v1018_v13 = vmul.f32 %v878_v32, %v4217_v17  ;;  %v1019_v36 = vmul.f32 %v879_v52, %v4218_v18  ;;  %v1020_v62 = vmul.f32 %v880_v53, %v4220_v0 }
 0x129   :  { %v1982_v21 = vpop.eup %1981  ;;  %v1575_v19 = vmul.f32 %v1980_v31, %v4143_v26  ;;  %1713 = vst [vmem:[#allocation2 + $0x2e0] sm:$0xff] %v1573_v8  ;;  %v1021_v42 = vmul.f32 %v881_v38, %v4221_v7  ;;  %v890_v27 = vsub.f32 0.0, %v3393_v39  ;;  %v891_v14 = vsub.f32 0.0, %v3397_v33 }
 0x12a   :  { %v1984_v28 = vpop.eup %1983  ;;  %v1576_v63 = vmul.f32 %v1982_v21, %v4144_v57  ;;  %1714 = vst [vmem:[#allocation2 + $0x2e8] sm:$0xff] %v1574_v56  ;;  %v1022_v17 = vmul.f32 %v882_v15, %v4223_v4  ;;  %v892_v18 = vsub.f32 0.0, %v3402_v49  ;;  %v893_v0 = vsub.f32 0.0, %v3406_v40 }
 0x12b   :  { %v1986_v44 = vpop.eup %1985  ;;  %v1577_v32 = vmul.f32 %v1984_v28, %v2912_v60  ;;  %1715 = vst [vmem:[#allocation2 + $0x2f0] sm:$0xff] %v1575_v19  ;;  %v1023_v7 = vmul.f32 %v883_v2, %v4224_v59  ;;  %v1024_v39 = vmul.f32 %v884_v55, %v4226_v51  ;;  %v1025_v33 = vmul.f32 %v885_v6, %v4227_v43 }
 0x12c   :  { %v1988_v53 = vpop.eup %1987  ;;  %v1578_v52 = vmul.f32 %v1986_v44, %v2916_v20  ;;  %1716 = vst [vmem:[#allocation2 + $0x2f8] sm:$0xff] %v1576_v63  ;;  %v1218_v38 = vmul.f32 1.442695, %v1018_v13  ;;  %v1220_v8 = vmul.f32 1.442695, %v1019_v36  ;;  %v1026_v59 = vmul.f32 %v886_v16, %v4229_v24  ;;  %v4243_v44 = vld [vmem:[#allocation26_spill] sm:$0xff] }
 0x12d   :  { %v1990_v15 = vpop.eup %1989  ;;  %v1579_v4 = vmul.f32 %v1988_v53, %v2920_v45  ;;  %1717 = vst [vmem:[#allocation2 + $0x300] sm:$0xff] %v1577_v32  ;;  %v1222_v31 = vmul.f32 1.442695, %v1020_v62  ;;  %v1224_v49 = vmul.f32 1.442695, %v1021_v42  ;;  %v894_v51 = vsub.f32 0.0, %v3411_v35 }
 0x12e   :  { %v1580_v40 = vmul.f32 %v1990_v15, %v2924_v54  ;;  %1718 = vst [vmem:[#allocation2 + $0x308] sm:$0xff] %v1578_v52  ;;  %1991 = vpow2.f32 %v1218_v38  ;;  %v1226_v2 = vmul.f32 1.442695, %v1022_v17  ;;  %v1027_v43 = vmul.f32 %v887_v46, %v4230_v29  ;;  %v4246_v53 = vld [vmem:[#allocation5_spill] sm:$0xff]  ;;  %v4248_v15 = vld [vmem:[#allocation28_spill] sm:$0xff] }
 0x12f   :  { %1719 = vst [vmem:[#allocation2 + $0x310] sm:$0xff] %v1579_v4  ;;  %1993 = vpow2.f32 %v1220_v8  ;;  %v1228_v55 = vmul.f32 1.442695, %v1023_v7  ;;  %v895_v6 = vsub.f32 0.0, %v3415_v11  ;;  %v1028_v56 = vmul.f32 %v888_v34, %v4232_v1  ;;  %v4245_v7 = vld [vmem:[#allocation41_spill] sm:$0xff]  ;;  %v4249_v8 = vld [vmem:[#allocation7_spill] sm:$0xff] }
 0x130   :  { %1720 = vst [vmem:[#allocation2 + $0x318] sm:$0xff] %v1580_v40  ;;  %1995 = vpow2.f32 %v1222_v31  ;;  %v1230_v13 = vmul.f32 1.442695, %v1024_v39  ;;  %v896_v21 = vsub.f32 0.0, %v3420_v61  ;;  %v1029_v24 = vmul.f32 %v889_v58, %v4233_v50  ;;  %v4247_v39 = vld [vmem:[#allocation6_spill] sm:$0xff] }
 0x131   :  { %1997 = vpow2.f32 %v1224_v49  ;;  %v1232_v16 = vmul.f32 1.442695, %v1025_v33  ;;  %v897_v19 = vsub.f32 0.0, %v3424_v37  ;;  %v1030_v35 = vmul.f32 %v890_v27, %v4235_v23  ;;  %v4242_v27 = vld [vmem:[#allocation25_spill] sm:$0xff]  ;;  %v4250_v49 = vld [vmem:[#allocation8_spill] sm:$0xff] }
 0x132   :  { %1999 = vpow2.f32 %v1226_v2  ;;  %v1234_v29 = vmul.f32 1.442695, %v1026_v59  ;;  %v1031_v46 = vmul.f32 %v891_v14, %v4236_v9  ;;  %v1236_v11 = vmul.f32 1.442695, %v1027_v43  ;;  %v4251_v2 = vld [vmem:[#allocation29_spill] sm:$0xff] }
 0x133   :  { %2001 = vpow2.f32 %v1228_v55  ;;  %v1032_v1 = vmul.f32 %v892_v18, %v4238_v47  ;;  %v1033_v34 = vmul.f32 %v893_v0, %v4239_v48  ;;  %v1238_v61 = vmul.f32 1.442695, %v1028_v56  ;;  %v4244_v18 = vld [vmem:[#allocation27_spill] sm:$0xff]  ;;  %v4252_v43 = vld [vmem:[#allocation9_spill] sm:$0xff] }
 0x134   :  { %2003 = vpow2.f32 %v1230_v13  ;;  %v1034_v50 = vmul.f32 %v894_v51, %v4241_v41  ;;  %v1035_v58 = vmul.f32 %v895_v6, %v3324_v30  ;;  %v1240_v37 = vmul.f32 1.442695, %v1029_v24  ;;  %v4253_v6 = vld [vmem:[#allocation10_spill] sm:$0xff] }
 0x135   :  { %2005 = vpow2.f32 %v1232_v16  ;;  %v1036_v23 = vmul.f32 %v896_v21, %v3328_v5  ;;  %v1037_v36 = vmul.f32 %v897_v19, %v3332_v10  ;;  %v1242_v9 = vmul.f32 1.442695, %v1030_v35  ;;  %v4254_v21 = vld [vmem:[#allocation30_spill] sm:$0xff]  ;;  %v4255_v16 = vld [vmem:[#allocation11_spill] sm:$0xff]  ;;  %v4256_v35 = vld [vmem:[#allocation12_spill] sm:$0xff] }
 0x136   :  { %2007 = vpow2.f32 %v1234_v29  ;;  %v1244_v62 = vmul.f32 1.442695, %v1031_v46  ;;  %v1246_v47 = vmul.f32 1.442695, %v1032_v1  ;;  %v1248_v48 = vmul.f32 1.442695, %v1033_v34 }
 0x137   :  { %2009 = vpow2.f32 %v1236_v11  ;;  %v1250_v63 = vmul.f32 1.442695, %v1034_v50  ;;  %v1252_v41 = vmul.f32 1.442695, %v1035_v58  ;;  %v1254_v17 = vmul.f32 1.442695, %v1036_v23 }
 0x138   :  { %v1992_v42 = vpop.eup %1991  ;;  %2011 = vpow2.f32 %v1238_v61  ;;  %v1256_v5 = vmul.f32 1.442695, %v1037_v36  ;;  %v3481_v52 = vsub.f32 %v4246_v53, %v4245_v7  ;;  %v3485_v33 = vsub.f32 %v4247_v39, %v4245_v7  ;;  %v4257_v11 = vld [vmem:[#allocation31_spill] sm:$0xff]  ;;  %v4258_v34 = vld [vmem:[#allocation13_spill] sm:$0xff]  ;;  %v4259_v50 = vld [vmem:[#allocation14_spill] sm:$0xff] }
 0x139   :  { %v1994_v28 = vpop.eup %1993  ;;  %2013 = vpow2.f32 %v1240_v37  ;;  %v1541_v30 = vmul.f32 %v1992_v42, %v4242_v27  ;;  %v3490_v31 = vsub.f32 %v4249_v8, %v4245_v7  ;;  %v3494_v40 = vsub.f32 %v4250_v49, %v4245_v7  ;;  %v4260_v23 = vld [vmem:[#allocation32_spill] sm:$0xff] }
 0x13a   :  { %v1996_v14 = vpop.eup %1995  ;;  %2015 = vpow2.f32 %v1242_v9  ;;  %v1542_v10 = vmul.f32 %v1994_v28, %v4243_v44  ;;  %v3499_v55 = vsub.f32 %v4252_v43, %v4245_v7  ;;  %v3503_v56 = vsub.f32 %v4253_v6, %v4245_v7  ;;  %v4261_v9 = vld [vmem:[#allocation15_spill] sm:$0xff]  ;;  %v4262_v42 = vld [vmem:[#allocation16_spill] sm:$0xff]  ;;  %v4263_v28 = vld [vmem:[#allocation33_spill] sm:$0xff] }
 0x13b   :  { %v1998_v32 = vpop.eup %1997  ;;  %2017 = vpow2.f32 %v1244_v62  ;;  %v1543_v0 = vmul.f32 %v1996_v14, %v4244_v18  ;;  %1681 = vst [vmem:[#allocation2 + $0x1e0] sm:$0xff] %v1541_v30  ;;  %v3508_v19 = vsub.f32 %v4255_v16, %v4245_v7  ;;  %v3512_v29 = vsub.f32 %v4256_v35, %v4245_v7  ;;  %v4264_v30 = vld [vmem:[#allocation17_spill] sm:$0xff] }
 0x13c   :  { %v2000_v38 = vpop.eup %1999  ;;  %2019 = vpow2.f32 %v1246_v47  ;;  %v1544_v4 = vmul.f32 %v1998_v32, %v4248_v15  ;;  %1682 = vst [vmem:[#allocation2 + $0x1e8] sm:$0xff] %v1542_v10  ;;  %v3517_v61 = vsub.f32 %v4258_v34, %v4245_v7  ;;  %v3521_v58 = vsub.f32 %v4259_v50, %v4245_v7 }
 0x13d   :  { %v2002_v59 = vpop.eup %2001  ;;  %2021 = vpow2.f32 %v1248_v48  ;;  %v1545_v51 = vmul.f32 %v2000_v38, %v4251_v2  ;;  %1683 = vst [vmem:[#allocation2 + $0x1f0] sm:$0xff] %v1543_v0  ;;  %v3526_v62 = vsub.f32 %v4261_v9, %v4245_v7  ;;  %v3530_v47 = vsub.f32 %v4262_v42, %v4245_v7  ;;  %v4266_v0 = vld [vmem:[#allocation34_spill] sm:$0xff] }
 0x13e   :  { %v2004_v13 = vpop.eup %2003  ;;  %2023 = vpow2.f32 %v1250_v63  ;;  %v1546_v24 = vmul.f32 %v2002_v59, %v4254_v21  ;;  %1684 = vst [vmem:[#allocation2 + $0x1f8] sm:$0xff] %v1544_v4  ;;  %v3537_v14 = vsub.f32 %v4264_v30, %v4245_v7  ;;  %v4267_v4 = vld [vmem:[#allocation19_spill] sm:$0xff]  ;;  %v4268_v59 = vld [vmem:[#allocation20_spill] sm:$0xff] }
 0x13f   :  { %v2006_v46 = vpop.eup %2005  ;;  %2025 = vpow2.f32 %v1252_v41  ;;  %v1547_v1 = vmul.f32 %v2004_v13, %v4257_v11  ;;  %1685 = vst [vmem:[#allocation2 + $0x200] sm:$0xff] %v1545_v51  ;;  %v3533_v41 = vpop.permute.xlu1 %675  ;;  %v3550_v51 = vsub.f32 %v4268_v59, %v4245_v7  ;;  %v4269_v13 = vld [vmem:[#allocation21_spill] sm:$0xff] }
 0x140   :  { %v2008_v37 = vpop.eup %2007  ;;  %2027 = vpow2.f32 %v1254_v17  ;;  %v1548_v36 = vmul.f32 %v2006_v46, %v4260_v23  ;;  %1686 = vst [vmem:[#allocation2 + $0x208] sm:$0xff] %v1546_v24  ;;  %v4265_v17 = vld [vmem:[#allocation18_spill] sm:$0xff]  ;;  %v3554_v24 = vsub.f32 %v4269_v13, %v4245_v7  ;;  %v807_v42 = vmul.f32 %v3533_v41, %v3521_v58 }
 0x141   :  { %v2010_v48 = vpop.eup %2009  ;;  %2029 = vpow2.f32 %v1256_v5  ;;  %v1549_v63 = vmul.f32 %v2008_v37, %v4263_v28  ;;  %1687 = vst [vmem:[#allocation2 + $0x210] sm:$0xff] %v1547_v1  ;;  %v3541_v10 = vsub.f32 %v4265_v17, %v4245_v7  ;;  %v3546_v5 = vsub.f32 %v4267_v4, %v4245_v7  ;;  %v4270_v37 = vld [vmem:[#allocation22_spill] sm:$0xff]  ;;  %v4272_v4 = vld [vmem:[#allocation24_spill] sm:$0xff] }
 0x142   :  { %v2012_v32 = vpop.eup %2011  ;;  %v1550_v38 = vmul.f32 %v2010_v48, %v4266_v0  ;;  %1688 = vst [vmem:[#allocation2 + $0x218] sm:$0xff] %v1548_v36  ;;  %v3559_v48 = vsub.f32 %v4270_v37, %v4245_v7  ;;  %v4271_v36 = vld [vmem:[#allocation23_spill] sm:$0xff]  ;;  %v3567_v59 = vsub.f32 %v4272_v4, %v4245_v7  ;;  %v804_v28 = vmul.f32 %v3533_v41, %v3508_v19 }
 0x143   :  { %v2014_v46 = vpop.eup %2013  ;;  %v1551_v1 = vmul.f32 %v2012_v32, %v4176_v25  ;;  %1689 = vst [vmem:[#allocation2 + $0x220] sm:$0xff] %v1549_v63  ;;  %v3563_v0 = vsub.f32 %v4271_v36, %v4245_v7  ;;  %v798_v32 = vmul.f32 %v3533_v41, %v3481_v52  ;;  %v799_v63 = vmul.f32 %v3533_v41, %v3485_v33 }
 0x144   :  { %v2016_v17 = vpop.eup %2015  ;;  %v1552_v13 = vmul.f32 %v2014_v46, %v4177_v12  ;;  %1690 = vst [vmem:[#allocation2 + $0x228] sm:$0xff] %v1550_v38  ;;  %v800_v25 = vmul.f32 %v3533_v41, %v3490_v31  ;;  %v801_v7 = vmul.f32 %v3533_v41, %v3494_v40  ;;  %v802_v46 = vmul.f32 %v3533_v41, %v3499_v55 }
 0x145   :  { %v2018_v37 = vpop.eup %2017  ;;  %v1553_v36 = vmul.f32 %v2016_v17, %v4178_v3  ;;  %1691 = vst [vmem:[#allocation2 + $0x230] sm:$0xff] %v1551_v1  ;;  %v803_v38 = vmul.f32 %v3533_v41, %v3503_v56  ;;  %v805_v17 = vmul.f32 %v3533_v41, %v3512_v29  ;;  %v806_v1 = vmul.f32 %v3533_v41, %v3517_v61 }
 0x146   :  { %v2020_v4 = vpop.eup %2019  ;;  %v1554_v12 = vmul.f32 %v2018_v37, %v4142_v22  ;;  %1692 = vst [vmem:[#allocation2 + $0x238] sm:$0xff] %v1552_v13  ;;  %v3595_v37 = vmul.f32 %v3533_v41, %v3526_v62  ;;  %v3599_v13 = vmul.f32 %v3533_v41, %v3530_v47  ;;  %v938_v9 = vsub.f32 0.0, %v798_v32 }
 0x147   :  { %v2022_v3 = vpop.eup %2021  ;;  %v1555_v30 = vmul.f32 %v2020_v4, %v4143_v26  ;;  %1693 = vst [vmem:[#allocation2 + $0x240] sm:$0xff] %v1553_v36  ;;  %v939_v50 = vsub.f32 0.0, %v799_v63  ;;  %v940_v11 = vsub.f32 0.0, %v800_v25  ;;  %v810_v26 = vmul.f32 %v3533_v41, %v3537_v14 }
 0x148   :  { %v2024_v22 = vpop.eup %2023  ;;  %v1556_v23 = vmul.f32 %v2022_v3, %v4144_v57  ;;  %1694 = vst [vmem:[#allocation2 + $0x248] sm:$0xff] %v1554_v12  ;;  %v811_v34 = vmul.f32 %v3533_v41, %v3541_v10  ;;  %v941_v35 = vsub.f32 0.0, %v801_v7  ;;  %v812_v3 = vmul.f32 %v3533_v41, %v3546_v5 }
 0x149   :  { %v2026_v4 = vpop.eup %2025  ;;  %v1557_v36 = vmul.f32 %v2024_v22, %v2912_v60  ;;  %1695 = vst [vmem:[#allocation2 + $0x250] sm:$0xff] %v1555_v30  ;;  %v813_v25 = vmul.f32 %v3533_v41, %v3550_v51  ;;  %v942_v12 = vsub.f32 0.0, %v802_v46  ;;  %v814_v32 = vmul.f32 %v3533_v41, %v3554_v24 }
 0x14a   :  { %v2028_v21 = vpop.eup %2027  ;;  %v1558_v16 = vmul.f32 %v2026_v4, %v2916_v20  ;;  %1696 = vst [vmem:[#allocation2 + $0x258] sm:$0xff] %v1556_v23  ;;  %v943_v63 = vsub.f32 0.0, %v803_v38  ;;  %v944_v7 = vsub.f32 0.0, %v804_v28  ;;  %v1078_v23 = vmul.f32 %v938_v9, %v3481_v52 }
 0x14b   :  { %v2030_v22 = vpop.eup %2029  ;;  %v1559_v30 = vmul.f32 %v2028_v21, %v2920_v45  ;;  %1697 = vst [vmem:[#allocation2 + $0x260] sm:$0xff] %v1557_v36  ;;  %v1079_v4 = vmul.f32 %v939_v50, %v3485_v33  ;;  %v1080_v20 = vmul.f32 %v940_v11, %v3490_v31  ;;  %v815_v46 = vmul.f32 %v3533_v41, %v3559_v48 }
 0x14c   :  { %v1560_v60 = vmul.f32 %v2030_v22, %v2924_v54  ;;  %1698 = vst [vmem:[#allocation2 + $0x268] sm:$0xff] %v1558_v16  ;;  %v816_v21 = vmul.f32 %v3533_v41, %v3563_v0  ;;  %v945_v36 = vsub.f32 0.0, %v805_v17  ;;  %v1081_v38 = vmul.f32 %v941_v35, %v3494_v40 }
 0x14d   :  { %1699 = vst [vmem:[#allocation2 + $0x270] sm:$0xff] %v1559_v30  ;;  %v817_v16 = vmul.f32 %v3533_v41, %v3567_v59  ;;  %v946_v28 = vsub.f32 0.0, %v806_v1  ;;  %v947_v52 = vsub.f32 0.0, %v807_v42  ;;  %v1082_v33 = vmul.f32 %v942_v12, %v3499_v55 }
 0x14e   :  { %1700 = vst [vmem:[#allocation2 + $0x278] sm:$0xff] %v1560_v60  ;;  %v948_v31 = vsub.f32 0.0, %v3595_v37  ;;  %v949_v11 = vsub.f32 0.0, %v3599_v13  ;;  %v950_v50 = vsub.f32 0.0, %v810_v26  ;;  %v1083_v9 = vmul.f32 %v943_v63, %v3503_v56 }
 0x14f   :  { %v1084_v22 = vmul.f32 %v944_v7, %v3508_v19  ;;  %v1338_v17 = vmul.f32 1.442695, %v1078_v23  ;;  %v1340_v30 = vmul.f32 1.442695, %v1079_v4  ;;  %v1342_v40 = vmul.f32 1.442695, %v1080_v20 }
 0x150   :  { %v951_v60 = vsub.f32 0.0, %v811_v34  ;;  %v952_v35 = vsub.f32 0.0, %v812_v3  ;;  %v1085_v41 = vmul.f32 %v945_v36, %v3512_v29  ;;  %v1344_v1 = vmul.f32 1.442695, %v1081_v38 }
 0x151   :  { %v953_v42 = vsub.f32 0.0, %v813_v25  ;;  %v1086_v55 = vmul.f32 %v946_v28, %v3517_v61  ;;  %2031 = vpow2.f32 %v1338_v17  ;;  %v1346_v37 = vmul.f32 1.442695, %v1082_v33 }
 0x152   :  { %v954_v12 = vsub.f32 0.0, %v814_v32  ;;  %v1087_v26 = vmul.f32 %v947_v52, %v3521_v58  ;;  %2033 = vpow2.f32 %v1340_v30  ;;  %v1348_v56 = vmul.f32 1.442695, %v1083_v9 }
 0x153   :  { %v955_v13 = vsub.f32 0.0, %v815_v46  ;;  %v1088_v19 = vmul.f32 %v948_v31, %v3526_v62  ;;  %2035 = vpow2.f32 %v1342_v40  ;;  %v1350_v20 = vmul.f32 1.442695, %v1084_v22 }
 0x154   :  { %v956_v34 = vsub.f32 0.0, %v816_v21  ;;  %v1089_v3 = vmul.f32 %v949_v11, %v3530_v47  ;;  %2037 = vpow2.f32 %v1344_v1  ;;  %v1352_v29 = vmul.f32 1.442695, %v1085_v41  ;;  %v4274_v41 = vld [vmem:[#allocation11_spill] sm:$0xff] }
 0x155   :  { %v957_v25 = vsub.f32 0.0, %v817_v16  ;;  %v1090_v61 = vmul.f32 %v950_v50, %v3537_v14  ;;  %2039 = vpow2.f32 %v1346_v37  ;;  %v1354_v63 = vmul.f32 1.442695, %v1086_v55  ;;  %v4273_v16 = vld [vmem:[#allocation84_spill] sm:$0xff] }
 0x156   :  { %v1091_v32 = vmul.f32 %v951_v60, %v3541_v10  ;;  %2041 = vpow2.f32 %v1348_v56  ;;  %v1356_v58 = vmul.f32 1.442695, %v1087_v26  ;;  %v1092_v7 = vmul.f32 %v952_v35, %v3546_v5 }
 0x157   :  { %v1093_v62 = vmul.f32 %v953_v42, %v3550_v51  ;;  %2043 = vpow2.f32 %v1350_v20  ;;  %v1358_v23 = vmul.f32 1.442695, %v1088_v19  ;;  %v1094_v4 = vmul.f32 %v954_v12, %v3554_v24  ;;  %v4277_v12 = vld [vmem:[#allocation13_spill] sm:$0xff]  ;;  %v4279_v19 = vld [vmem:[#allocation14_spill] sm:$0xff] }
 0x158   :  { %v1095_v47 = vmul.f32 %v955_v13, %v3559_v48  ;;  %2045 = vpow2.f32 %v1352_v29  ;;  %v1360_v46 = vmul.f32 1.442695, %v1089_v3  ;;  %v1096_v14 = vmul.f32 %v956_v34, %v3563_v0  ;;  %v4280_v34 = vld [vmem:[#allocation15_spill] sm:$0xff] }
 0x159   :  { %v1097_v21 = vmul.f32 %v957_v25, %v3567_v59  ;;  %2047 = vpow2.f32 %v1354_v63  ;;  %v1362_v10 = vmul.f32 1.442695, %v1090_v61  ;;  %v1364_v36 = vmul.f32 1.442695, %v1091_v32  ;;  %v4281_v25 = vld [vmem:[#allocation32_spill] sm:$0xff]  ;;  %v3696_v63 = vpop.permute.xlu0 %670 }
 0x15a   :  { %2049 = vpow2.f32 %v1356_v58  ;;  %v1366_v5 = vmul.f32 1.442695, %v1092_v7  ;;  %v1368_v51 = vmul.f32 1.442695, %v1093_v62  ;;  %v3646_v28 = vsub.f32 %v4246_v53, %v4273_v16  ;;  %v4282_v32 = vld [vmem:[#allocation16_spill] sm:$0xff]  ;;  %v4283_v7 = vld [vmem:[#allocation17_spill] sm:$0xff] }
 0x15b   :  { %v2032_v38 = vpop.eup %2031  ;;  %2051 = vpow2.f32 %v1358_v23  ;;  %v1370_v48 = vmul.f32 1.442695, %v1094_v4  ;;  %v1372_v52 = vmul.f32 1.442695, %v1095_v47  ;;  %v1374_v59 = vmul.f32 1.442695, %v1096_v14 }
 0x15c   :  { %v2034_v24 = vpop.eup %2033  ;;  %2053 = vpow2.f32 %v1360_v46  ;;  %v1601_v0 = vmul.f32 %v2032_v38, %v4242_v27  ;;  %v1376_v31 = vmul.f32 1.442695, %v1097_v21  ;;  %v3653_v53 = vsub.f32 %v4247_v39, %v4273_v16  ;;  %v4284_v4 = vld [vmem:[#allocation33_spill] sm:$0xff]  ;;  %v4285_v46 = vld [vmem:[#allocation18_spill] sm:$0xff]  ;;  %v4286_v21 = vld [vmem:[#allocation19_spill] sm:$0xff] }
 0x15d   :  { %v2036_v33 = vpop.eup %2035  ;;  %2055 = vpow2.f32 %v1362_v10  ;;  %v1602_v11 = vmul.f32 %v2034_v24, %v4243_v44  ;;  %v3657_v22 = vsub.f32 %v4249_v8, %v4273_v16  ;;  %v3662_v40 = vsub.f32 %v4250_v49, %v4273_v16  ;;  %v4275_v49 = vld [vmem:[#allocation30_spill] sm:$0xff] }
 0x15e   :  { %v2038_v50 = vpop.eup %2037  ;;  %2057 = vpow2.f32 %v1364_v36  ;;  %v1603_v9 = vmul.f32 %v2036_v33, %v4244_v18  ;;  %1741 = vst [vmem:[#allocation2 + $0x3c0] sm:$0x3] %v1601_v0  ;;  %v3666_v60 = vsub.f32 %v4252_v43, %v4273_v16  ;;  %v3671_v8 = vsub.f32 %v4253_v6, %v4273_v16  ;;  %v4276_v43 = vld [vmem:[#allocation12_spill] sm:$0xff]  ;;  %v4278_v6 = vld [vmem:[#allocation31_spill] sm:$0xff]  ;;  %v4287_v38 = vld [vmem:[#allocation34_spill] sm:$0xff] }
 0x15f   :  { %v2040_v17 = vpop.eup %2039  ;;  %2059 = vpow2.f32 %v1366_v5  ;;  %v1604_v30 = vmul.f32 %v2038_v50, %v4248_v15  ;;  %1742 = vst [vmem:[#allocation2 + $0x3c8] sm:$0x3] %v1602_v11  ;;  %v3675_v1 = vsub.f32 %v4274_v41, %v4273_v16  ;;  %v3680_v37 = vsub.f32 %v4276_v43, %v4273_v16  ;;  %v4290_v0 = vld [vmem:[#allocation22_spill] sm:$0xff]  ;;  %v4293_v41 = vld [vmem:[#allocation23_spill] sm:$0xff] }
 0x160   :  { %v2042_v35 = vpop.eup %2041  ;;  %2061 = vpow2.f32 %v1368_v51  ;;  %v1605_v39 = vmul.f32 %v2040_v17, %v4251_v2  ;;  %1743 = vst [vmem:[#allocation2 + $0x3d0] sm:$0x3] %v1603_v9  ;;  %v3684_v26 = vsub.f32 %v4277_v12, %v4273_v16  ;;  %v3689_v20 = vsub.f32 %v4279_v19, %v4273_v16  ;;  %v4288_v51 = vld [vmem:[#allocation20_spill] sm:$0xff] }
 0x161   :  { %v2044_v42 = vpop.eup %2043  ;;  %2063 = vpow2.f32 %v1370_v48  ;;  %v1606_v55 = vmul.f32 %v2042_v35, %v4275_v49  ;;  %1744 = vst [vmem:[#allocation2 + $0x3d8] sm:$0x3] %v1604_v30  ;;  %v3693_v3 = vsub.f32 %v4280_v34, %v4273_v16  ;;  %v3700_v58 = vsub.f32 %v4282_v32, %v4273_v16  ;;  %v4289_v48 = vld [vmem:[#allocation21_spill] sm:$0xff]  ;;  %v4292_v35 = vld [vmem:[#allocation36_spill] sm:$0xff] }
 0x162   :  { %v2046_v56 = vpop.eup %2045  ;;  %2065 = vpow2.f32 %v1372_v52  ;;  %v1607_v13 = vmul.f32 %v2044_v42, %v4278_v6  ;;  %1745 = vst [vmem:[#allocation2 + $0x3e0] sm:$0x3] %v1605_v39  ;;  %v3704_v62 = vsub.f32 %v4283_v7, %v4273_v16  ;;  %v3709_v14 = vsub.f32 %v4285_v46, %v4273_v16  ;;  %v4296_v7 = vld [vmem:[#allocation38_spill] sm:$0xff] }
 0x163   :  { %v2048_v29 = vpop.eup %2047  ;;  %2067 = vpow2.f32 %v1374_v59  ;;  %v1608_v61 = vmul.f32 %v2046_v56, %v4281_v25  ;;  %1746 = vst [vmem:[#allocation2 + $0x3e8] sm:$0x3] %v1606_v55  ;;  %v3713_v10 = vsub.f32 %v4286_v21, %v4273_v16  ;;  %v3718_v24 = vsub.f32 %v4288_v51, %v4273_v16  ;;  %v4294_v55 = vld [vmem:[#allocation24_spill] sm:$0xff] }
 0x164   :  { %v2050_v23 = vpop.eup %2049  ;;  %2069 = vpow2.f32 %v1376_v31  ;;  %v1609_v47 = vmul.f32 %v2048_v29, %v4284_v4  ;;  %1747 = vst [vmem:[#allocation2 + $0x3f0] sm:$0x3] %v1607_v13  ;;  %v3722_v52 = vsub.f32 %v4289_v48, %v4273_v16  ;;  %v3726_v33 = vsub.f32 %v4290_v0, %v4273_v16  ;;  %v4291_v31 = vld [vmem:[#allocation35_spill] sm:$0xff]  ;;  %v4295_v13 = vld [vmem:[#allocation37_spill] sm:$0xff] }
 0x165   :  { %v2052_v36 = vpop.eup %2051  ;;  %v1610_v5 = vmul.f32 %v2050_v23, %v4287_v38  ;;  %1748 = vst [vmem:[#allocation2 + $0x3f8] sm:$0x3] %v1608_v61  ;;  %v778_v50 = vmul.f32 %v3696_v63, %v3646_v28  ;;  %v779_v9 = vmul.f32 %v3696_v63, %v3653_v53  ;;  %v780_v17 = vmul.f32 %v3696_v63, %v3657_v22 }
 0x166   :  { %v2054_v59 = vpop.eup %2053  ;;  %v1611_v11 = vmul.f32 %v2052_v36, %v4291_v31  ;;  %1749 = vst [vmem:[#allocation2 + $0x400] sm:$0x3] %v1609_v47  ;;  %v3738_v42 = vsub.f32 %v4293_v41, %v4273_v16  ;;  %v3742_v43 = vsub.f32 %v4294_v55, %v4273_v16  ;;  %v781_v12 = vmul.f32 %v3696_v63, %v3662_v40  ;;  %v4297_v36 = vld [vmem:[#allocation39_spill] sm:$0xff] }
 0x167   :  { %v2056_v30 = vpop.eup %2055  ;;  %v1612_v39 = vmul.f32 %v2054_v59, %v4292_v35  ;;  %1750 = vst [vmem:[#allocation2 + $0x408] sm:$0x3] %v1610_v5  ;;  %v782_v34 = vmul.f32 %v3696_v63, %v3666_v60  ;;  %v783_v29 = vmul.f32 %v3696_v63, %v3671_v8  ;;  %v784_v61 = vmul.f32 %v3696_v63, %v3675_v1 }
 0x168   :  { %v2058_v56 = vpop.eup %2057  ;;  %v1613_v19 = vmul.f32 %v2056_v30, %v4295_v13  ;;  %1751 = vst [vmem:[#allocation2 + $0x410] sm:$0x3] %v1611_v11  ;;  %v785_v23 = vmul.f32 %v3696_v63, %v3680_v37  ;;  %v786_v47 = vmul.f32 %v3696_v63, %v3684_v26  ;;  %v787_v46 = vmul.f32 %v3696_v63, %v3689_v20 }
 0x169   :  { %v2060_v32 = vpop.eup %2059  ;;  %v1614_v16 = vmul.f32 %v2058_v56, %v4296_v7  ;;  %1752 = vst [vmem:[#allocation2 + $0x418] sm:$0x3] %v1612_v39  ;;  %v918_v51 = vsub.f32 0.0, %v778_v50  ;;  %v919_v48 = vsub.f32 0.0, %v779_v9  ;;  %v920_v0 = vsub.f32 0.0, %v780_v17  ;;  %v4298_v56 = vld [vmem:[#allocation116_spill] sm:$0xff] }
 0x16a   :  { %v2062_v21 = vpop.eup %2061  ;;  %v1615_v5 = vmul.f32 %v2060_v32, %v4297_v36  ;;  %1753 = vst [vmem:[#allocation2 + $0x420] sm:$0x3] %v1613_v19  ;;  %v788_v30 = vmul.f32 %v3696_v63, %v3693_v3  ;;  %v789_v39 = vmul.f32 %v3696_v63, %v3700_v58  ;;  %v921_v41 = vsub.f32 0.0, %v781_v12  ;;  %v4299_v32 = vld [vmem:[#allocation117_spill] sm:$0xff] }
 0x16b   :  { %v2064_v59 = vpop.eup %2063  ;;  %v1616_v11 = vmul.f32 %v2062_v21, %v4144_v57  ;;  %1754 = vst [vmem:[#allocation2 + $0x428] sm:$0x3] %v1614_v16  ;;  %v790_v50 = vmul.f32 %v3696_v63, %v3704_v62  ;;  %v791_v9 = vmul.f32 %v3696_v63, %v3709_v14  ;;  %v922_v17 = vsub.f32 0.0, %v782_v34 }
 0x16c   :  { %v2066_v55 = vpop.eup %2065  ;;  %v1617_v7 = vmul.f32 %v2064_v59, %v4298_v56  ;;  %1755 = vst [vmem:[#allocation2 + $0x430] sm:$0x3] %v1615_v5  ;;  %v792_v21 = vmul.f32 %v3696_v63, %v3713_v10  ;;  %v923_v57 = vsub.f32 0.0, %v783_v29  ;;  %v924_v12 = vsub.f32 0.0, %v784_v61 }
 0x16d   :  { %v2068_v19 = vpop.eup %2067  ;;  %v1618_v16 = vmul.f32 %v2066_v55, %v4299_v32  ;;  %1756 = vst [vmem:[#allocation2 + $0x438] sm:$0x3] %v1616_v11  ;;  %v1058_v5 = vmul.f32 %v918_v51, %v3646_v28  ;;  %v1059_v56 = vmul.f32 %v919_v48, %v3653_v53  ;;  %v1060_v13 = vmul.f32 %v920_v0, %v3657_v22 }
 0x16e   :  { %v2070_v36 = vpop.eup %2069  ;;  %v1619_v59 = vmul.f32 %v2068_v19, %v2920_v45  ;;  %1757 = vst [vmem:[#allocation2 + $0x440] sm:$0x3] %v1617_v7  ;;  %v793_v11 = vmul.f32 %v3696_v63, %v3718_v24  ;;  %v925_v55 = vsub.f32 0.0, %v785_v23  ;;  %v1061_v29 = vmul.f32 %v921_v41, %v3662_v40 }
 0x16f   :  { %v1620_v34 = vmul.f32 %v2070_v36, %v2924_v54  ;;  %1758 = vst [vmem:[#allocation2 + $0x448] sm:$0x3] %v1618_v16  ;;  %v794_v61 = vmul.f32 %v3696_v63, %v3722_v52  ;;  %v795_v28 = vmul.f32 %v3696_v63, %v3726_v33  ;;  %v926_v7 = vsub.f32 0.0, %v786_v47 }
 0x170   :  { %1759 = vst [vmem:[#allocation2 + $0x450] sm:$0x3] %v1619_v59  ;;  %v1062_v53 = vmul.f32 %v922_v17, %v3666_v60  ;;  %v796_v22 = vmul.f32 %v3696_v63, %v3738_v42  ;;  %v927_v36 = vsub.f32 0.0, %v787_v46  ;;  %v928_v51 = vsub.f32 0.0, %v788_v30 }
 0x171   :  { %1760 = vst [vmem:[#allocation2 + $0x458] sm:$0x3] %v1620_v34  ;;  %v1063_v23 = vmul.f32 %v923_v57, %v3671_v8  ;;  %v1064_v40 = vmul.f32 %v924_v12, %v3675_v1  ;;  %v1298_v48 = vmul.f32 1.442695, %v1058_v5  ;;  %v1300_v0 = vmul.f32 1.442695, %v1059_v56 }
 0x172   :  { %v1302_v41 = vmul.f32 1.442695, %v1060_v13  ;;  %v797_v19 = vmul.f32 %v3696_v63, %v3742_v43  ;;  %v929_v16 = vsub.f32 0.0, %v789_v39  ;;  %v1065_v47 = vmul.f32 %v925_v55, %v3680_v37 }
 0x173   :  { %v1304_v60 = vmul.f32 1.442695, %v1061_v29  ;;  %v930_v17 = vsub.f32 0.0, %v790_v50  ;;  %v1066_v59 = vmul.f32 %v926_v7, %v3684_v26  ;;  %2071 = vpow2.f32 %v1298_v48 }
 0x174   :  { %v1306_v46 = vmul.f32 1.442695, %v1062_v53  ;;  %v931_v30 = vsub.f32 0.0, %v791_v9  ;;  %v1067_v57 = vmul.f32 %v927_v36, %v3689_v20  ;;  %2073 = vpow2.f32 %v1300_v0 }
 0x175   :  { %v1308_v8 = vmul.f32 1.442695, %v1063_v23  ;;  %v932_v1 = vsub.f32 0.0, %v792_v21  ;;  %v1068_v13 = vmul.f32 %v928_v51, %v3693_v3  ;;  %2075 = vpow2.f32 %v1302_v41 }
 0x176   :  { %v1310_v56 = vmul.f32 1.442695, %v1064_v40  ;;  %v933_v63 = vsub.f32 0.0, %v793_v11  ;;  %v1069_v39 = vmul.f32 %v929_v16, %v3700_v58  ;;  %2077 = vpow2.f32 %v1304_v60 }
 0x177   :  { %v1312_v37 = vmul.f32 1.442695, %v1065_v47  ;;  %v934_v50 = vsub.f32 0.0, %v794_v61  ;;  %v1070_v26 = vmul.f32 %v930_v17, %v3704_v62  ;;  %2079 = vpow2.f32 %v1306_v46 }
 0x178   :  { %v1314_v12 = vmul.f32 1.442695, %v1066_v59  ;;  %v935_v9 = vsub.f32 0.0, %v795_v28  ;;  %v1071_v20 = vmul.f32 %v931_v30, %v3709_v14  ;;  %2081 = vpow2.f32 %v1308_v8 }
 0x179   :  { %v1316_v5 = vmul.f32 1.442695, %v1067_v57  ;;  %v936_v21 = vsub.f32 0.0, %v796_v22  ;;  %v1072_v3 = vmul.f32 %v932_v1, %v3713_v10  ;;  %2083 = vpow2.f32 %v1310_v56  ;;  %v4301_v56 = vld [vmem:[#allocation38_spill] sm:$0xff] }
 0x17a   :  { %v1318_v34 = vmul.f32 1.442695, %v1068_v13  ;;  %v937_v11 = vsub.f32 0.0, %v797_v19  ;;  %v1073_v58 = vmul.f32 %v933_v63, %v3718_v24  ;;  %2085 = vpow2.f32 %v1312_v37 }
 0x17b   :  { %v1320_v55 = vmul.f32 1.442695, %v1069_v39  ;;  %v1074_v29 = vmul.f32 %v934_v50, %v3722_v52  ;;  %2087 = vpow2.f32 %v1314_v12  ;;  %v1322_v62 = vmul.f32 1.442695, %v1070_v26  ;;  %v4302_v39 = vld [vmem:[#allocation39_spill] sm:$0xff]  ;;  %v4303_v50 = vld [vmem:[#allocation40_spill] sm:$0xff] }
 0x17c   :  { %v1075_v61 = vmul.f32 %v935_v9, %v3726_v33  ;;  %2089 = vpow2.f32 %v1316_v5  ;;  %v1324_v14 = vmul.f32 1.442695, %v1071_v20  ;;  %v1076_v7 = vmul.f32 %v936_v21, %v3738_v42  ;;  %v4304_v12 = vld [vmem:[#allocation116_spill] sm:$0xff] }
 0x17d   :  { %v2072_v28 = vpop.eup %2071  ;;  %2091 = vpow2.f32 %v1318_v34  ;;  %v1326_v10 = vmul.f32 1.442695, %v1072_v3  ;;  %v1077_v22 = vmul.f32 %v937_v11, %v3742_v43  ;;  %v1328_v24 = vmul.f32 1.442695, %v1073_v58 }
 0x17e   :  { %v2074_v53 = vpop.eup %2073  ;;  %2093 = vpow2.f32 %v1320_v55  ;;  %v1581_v36 = vmul.f32 %v2072_v28, %v4242_v27  ;;  %v1330_v52 = vmul.f32 1.442695, %v1074_v29  ;;  %v1332_v40 = vmul.f32 1.442695, %v1075_v61 }
 0x17f   :  { %v2076_v51 = vpop.eup %2075  ;;  %2095 = vpow2.f32 %v1322_v62  ;;  %v1582_v23 = vmul.f32 %v2074_v53, %v4243_v44  ;;  %v1334_v0 = vmul.f32 1.442695, %v1076_v7  ;;  %v1336_v27 = vmul.f32 1.442695, %v1077_v22 }
 0x180   :  { %v2078_v33 = vpop.eup %2077  ;;  %2097 = vpow2.f32 %v1324_v14  ;;  %v1583_v48 = vmul.f32 %v2076_v51, %v4244_v18  ;;  %1721 = vst [vmem:[#allocation2 + $0x320] sm:$0xff] %v1581_v36 }
 0x181   :  { %v2080_v42 = vpop.eup %2079  ;;  %2099 = vpow2.f32 %v1326_v10  ;;  %v1584_v43 = vmul.f32 %v2078_v33, %v4248_v15  ;;  %1722 = vst [vmem:[#allocation2 + $0x328] sm:$0xff] %v1582_v23 }
 0x182   :  { %v2082_v41 = vpop.eup %2081  ;;  %2101 = vpow2.f32 %v1328_v24  ;;  %v1585_v19 = vmul.f32 %v2080_v42, %v4251_v2  ;;  %1723 = vst [vmem:[#allocation2 + $0x330] sm:$0xff] %v1583_v48 }
 0x183   :  { %v2084_v16 = vpop.eup %2083  ;;  %2103 = vpow2.f32 %v1330_v52  ;;  %v1586_v44 = vmul.f32 %v2082_v41, %v4275_v49  ;;  %1724 = vst [vmem:[#allocation2 + $0x338] sm:$0xff] %v1584_v43 }
 0x184   :  { %v2086_v47 = vpop.eup %2085  ;;  %2105 = vpow2.f32 %v1332_v40  ;;  %v1587_v18 = vmul.f32 %v2084_v16, %v4278_v6  ;;  %1725 = vst [vmem:[#allocation2 + $0x340] sm:$0xff] %v1585_v19 }
 0x185   :  { %v2088_v60 = vpop.eup %2087  ;;  %2107 = vpow2.f32 %v1334_v0  ;;  %v1588_v15 = vmul.f32 %v2086_v47, %v4281_v25  ;;  %1726 = vst [vmem:[#allocation2 + $0x348] sm:$0xff] %v1586_v44  ;;  %v4300_v25 = vld [vmem:[#allocation37_spill] sm:$0xff] }
 0x186   :  { %v2090_v17 = vpop.eup %2089  ;;  %2109 = vpow2.f32 %v1336_v27  ;;  %v1589_v2 = vmul.f32 %v2088_v60, %v4284_v4  ;;  %1727 = vst [vmem:[#allocation2 + $0x350] sm:$0xff] %v1587_v18 }
 0x187   :  { %v2092_v59 = vpop.eup %2091  ;;  %v1590_v46 = vmul.f32 %v2090_v17, %v4287_v38  ;;  %1728 = vst [vmem:[#allocation2 + $0x358] sm:$0xff] %v1588_v15 }
 0x188   :  { %v2094_v49 = vpop.eup %2093  ;;  %v1591_v30 = vmul.f32 %v2092_v59, %v4291_v31  ;;  %1729 = vst [vmem:[#allocation2 + $0x360] sm:$0xff] %v1589_v2 }
 0x189   :  { %v2096_v6 = vpop.eup %2095  ;;  %v1592_v57 = vmul.f32 %v2094_v49, %v4292_v35  ;;  %1730 = vst [vmem:[#allocation2 + $0x368] sm:$0xff] %v1590_v46 }
 0x18a   :  { %v2098_v8 = vpop.eup %2097  ;;  %v1593_v1 = vmul.f32 %v2096_v6, %v4300_v25  ;;  %1731 = vst [vmem:[#allocation2 + $0x370] sm:$0xff] %v1591_v30 }
 0x18b   :  { %v2100_v13 = vpop.eup %2099  ;;  %v1594_v4 = vmul.f32 %v2098_v8, %v4301_v56  ;;  %1732 = vst [vmem:[#allocation2 + $0x378] sm:$0xff] %v1592_v57 }
 0x18c   :  { %v2102_v63 = vpop.eup %2101  ;;  %v1595_v38 = vmul.f32 %v2100_v13, %v4302_v39  ;;  %1733 = vst [vmem:[#allocation2 + $0x380] sm:$0xff] %v1593_v1 }
 0x18d   :  { %v2104_v37 = vpop.eup %2103  ;;  %v1596_v31 = vmul.f32 %v2102_v63, %v4303_v50  ;;  %1734 = vst [vmem:[#allocation2 + $0x388] sm:$0xff] %v1594_v4 }
 0x18e   :  { %v2106_v26 = vpop.eup %2105  ;;  %v1597_v35 = vmul.f32 %v2104_v37, %v4304_v12  ;;  %1735 = vst [vmem:[#allocation2 + $0x390] sm:$0xff] %v1595_v38 }
 0x18f   :  { %v2108_v9 = vpop.eup %2107  ;;  %v1598_v20 = vmul.f32 %v2106_v26, %v4299_v32  ;;  %1736 = vst [vmem:[#allocation2 + $0x398] sm:$0xff] %v1596_v31 }
 0x190   :  { %v2110_v5 = vpop.eup %2109  ;;  %v1599_v21 = vmul.f32 %v2108_v9, %v2920_v45  ;;  %1737 = vst [vmem:[#allocation2 + $0x3a0] sm:$0xff] %v1597_v35 }
 0x191   :  { %v1600_v3 = vmul.f32 %v2110_v5, %v2924_v54  ;;  %1738 = vst [vmem:[#allocation2 + $0x3a8] sm:$0xff] %v1598_v20 }
 0x192   :  { %1739 = vst [vmem:[#allocation2 + $0x3b0] sm:$0xff] %v1599_v21 }
 0x193   :  { %1740 = vst [vmem:[#allocation2 + $0x3b8] sm:$0xff] %v1600_v3 }
 0x194   :  { %2122 = shalt.err (!%p2119_p4)
}
 0x195   :  { %s2123_s21 = scalar_lea.hbm %s3841_s3, 17920 }
 0x196   :  { %p2124_p5 = scmp.ne.s32.totalorder %s3841_s3, %s2123_s21  ;;  %p2127_p6 = scmp.lt.u32.totalorder %s2123_s21, %s3841_s3 }
 0x198   :  { %p2129_p7 = pnand %p2127_p6, %p2124_p5 }
 0x19a   :  { %2132 = shalt.err (!%p2129_p7)
}
 0x19b   :  { %s2143_s26 = smov 2560   ;;  %s2144_s27 = smov 160  }
 0x19c   :  { %1772 = dma.vmem_to_hbm [thread:$0]  %s1767_s17, 17920, %s3841_s3, [#allocation3], %s2143_s26, %s2143_s26, %s2144_s27  }
 0x19d   :  { %2133 = dma.done.wait [#allocation3], 17920  }
 0x19e   :  { %2134 = vsyncadd [#allocation3], 4294949376 }
 0x19f   :  { %1776 = vsyncpa [#allocation3], 1 }

</bundles_post_ra>
